<compile_context>
chip_gen: v5e
topology: v5e:2x2
jax: 0.10.0
libtpu: 0.0.40
codegen_flags: <defaults>
</compile_context>

<pallas_src>
import functools

import jax
import jax.numpy as jnp
from jax import lax
from jax.experimental import pallas as pl
from jax.experimental.pallas import tpu as pltpu


def _round_up(x, m):
    return ((x + m - 1) // m) * m


SUB = 8  # sublane rows of the repacked pixel plane (full f32 vreg height)


# ------------------------------ Pallas kernel --------------------------------

def _solve_fft_kernel(a_ref, x_ref, d_ref, y_ref, o_ref, *, c_in, c_out):
    # a_ref : SMEM (N,)  per-batch alpha              (scalar prefetch)
    # x_ref : (2, C_in,  SUB, TL)      real/imag of X
    # d_ref : (2, C_out, C_in, SUB, TL)
    # y_ref : (2, C_out, SUB, TL)
    # o_ref : (2, C_in,  SUB, TL)
    a = a_ref[pl.program_id(0)] * (1.0 / c_in)      # scalar: alpha / C_in
    inv_a = 1.0 / a                                  # scalar

    xr = x_ref[0]                                    # (C_in, SUB, TL)
    xi = x_ref[1]
    dr = d_ref[0]                                    # (C_out, C_in, SUB, TL)
    di = d_ref[1]
    yr = y_ref[0][:, None]                           # (C_out, 1, SUB, TL)
    yi = y_ref[1][:, None]

    # Z = cmul(Y, D) + a * X   (Y broadcast over C_in, X over C_out)
    zr = yr * dr - yi * di + a * xr                  # (C_out, C_in, SUB, TL)
    zi = yr * di + yi * dr + a * xi

    # numerator   = sum_i conj(D) * Z        (complex, per output channel)
    # denominator = a * sum_i |D|^2 + a^2    (real,    per output channel)
    num_r = jnp.sum(dr * zr + di * zi, axis=1)       # (C_out, SUB, TL)
    num_i = jnp.sum(dr * zi - di * zr, axis=1)
    den = a * jnp.sum(dr * dr + di * di, axis=1) + a * a

    inv_den = pl.reciprocal(den, approx=True)        # EUP slot (free vs. VALU)
    inv_den = inv_den * (2.0 - den * inv_den)        # one Newton step -> ~f32 exact

    qr = (num_r * inv_den)[:, None]                  # (C_out, 1, SUB, TL)
    qi = (num_i * inv_den)[:, None]

    # out = mean_o ( Z / a - cmul(D, num/den) )
    diff_r = zr * inv_a - (dr * qr - di * qi)        # (C_out, C_in, SUB, TL)
    diff_i = zi * inv_a - (dr * qi + di * qr)
    c_out_inv = 1.0 / c_out
    o_ref[0, ...] = jnp.sum(diff_r, axis=0) * c_out_inv   # (C_in, SUB, TL)
    o_ref[1, ...] = jnp.sum(diff_i, axis=0) * c_out_inv


# --------------------------------- wrapper ------------------------------------

def _pick_lane_tile(c_in, c_out, lanes_needed):
    """VMEM-aware lane tile (multiple of 128)."""
    try:
        vmem_phys = pltpu.get_tpu_info().vmem_capacity_bytes
    except Exception:  # interpret mode / older jax
        vmem_phys = 64 << 20
    budget = min(vmem_phys // 6, 10 << 20)  # stay under default scoped limits

    # f32 bytes per lane column (SUB sublanes): double-buffered I/O blocks
    # plus the in-kernel temporaries (zr/zi/diff_r/diff_i, num/den/q).
    io_planes = 2 * (2 * c_in + 2 * c_out * c_in + 2 * c_out + 2 * c_in)
    tmp_planes = 6 * c_out * c_in + 6 * c_out
    bytes_per_lane = 4 * SUB * (io_planes + tmp_planes)

    tl = int(budget // bytes_per_lane) // 128 * 128
    tl = max(128, min(tl, 4096))
    if lanes_needed <= tl:
        return lanes_needed, lanes_needed
    return tl, _round_up(lanes_needed, tl)


def solve_fft(X, D, Y, alpha, x_size):
    """SolveFFT.forward.

    X: (N, 1, C_in, Hf, Wf, 2)   D: (N, C_out, C_in, Hf, Wf, 2)
    Y: (N, C_out, 1, Hf, Wf, 2)  alpha: (N, 1, 1, 1)
    x_size: (H_out, W_out) spatial size for the inverse rFFT.
    Returns: (N, C_in, H_out, W_out) real.
    """
    N, _, C_in, Hf, Wf, _ = X.shape
    C_out = D.shape[1]
    P = Hf * Wf

    lanes_needed = _round_up((P + SUB - 1) // SUB, 128)
    TL, LANE_TOT = _pick_lane_tile(C_in, C_out, lanes_needed)
    P_pad = SUB * LANE_TOT

    f32 = jnp.float32

    def planar(t):
        # (..., Hf, Wf, 2) -> (N, 2, ..., SUB, LANE_TOT) f32 (one fused
        # transpose + pad per tensor; the trailing reshapes are bitcasts).
        t = jnp.moveaxis(t, -1, 1).astype(f32)                      # r/i -> axis 1
        t = t.reshape(t.shape[:-2] + (P,))                          # merge Hf,Wf
        t = jnp.pad(t, [(0, 0)] * (t.ndim - 1) + [(0, P_pad - P)])  # zero pad -> den=a^2>0
        return t.reshape(t.shape[:-1] + (SUB, LANE_TOT))

    Xp = planar(X[:, 0])        # (N, 2, C_in,  SUB, LANE_TOT)
    Dp = planar(D)              # (N, 2, C_out, C_in, SUB, LANE_TOT)
    Yp = planar(Y[:, :, 0])     # (N, 2, C_out, SUB, LANE_TOT)
    a_arr = alpha.reshape(N).astype(f32)

    grid = (N, LANE_TOT // TL)
    kernel = functools.partial(_solve_fft_kernel, c_in=C_in, c_out=C_out)

    out = pl.pallas_call(
        kernel,
        out_shape=jax.ShapeDtypeStruct((N, 2, C_in, SUB, LANE_TOT), f32),
        grid_spec=pltpu.PrefetchScalarGridSpec(
            num_scalar_prefetch=1,          # alpha -> SMEM
            grid=grid,
            in_specs=[
                pl.BlockSpec((None, 2, C_in, SUB, TL),
                             lambda b, t, a: (b, 0, 0, 0, t)),              # X
                pl.BlockSpec((None, 2, C_out, C_in, SUB, TL),
                             lambda b, t, a: (b, 0, 0, 0, 0, t)),           # D
                pl.BlockSpec((None, 2, C_out, SUB, TL),
                             lambda b, t, a: (b, 0, 0, 0, t)),              # Y
            ],
            out_specs=pl.BlockSpec((None, 2, C_in, SUB, TL),
                                   lambda b, t, a: (b, 0, 0, 0, t)),
        ),
        compiler_params=pltpu.CompilerParams(
            dimension_semantics=("parallel", "parallel")),
    )(a_arr, Xp, Dp, Yp)

    out = out.reshape(N, 2, C_in, P_pad)[..., :P].reshape(N, 2, C_in, Hf, Wf)
    Xc = lax.complex(out[:, 0], out[:, 1])
    h_out, w_out = int(x_size[0]), int(x_size[1])
    # TODO(synk): no FFT primitive in Pallas TPU -- the inverse rFFT stays in XLA.
    return jnp.fft.irfft2(Xc, s=(h_out, w_out), axes=(-2, -1))


# ------------------------- pure-JAX reference (check) -------------------------

def _solve_fft_reference(X, D, Y, alpha, x_size):
    def cmul(t1, t2):
        r1, i1 = t1[..., 0], t1[..., 1]
        r2, i2 = t2[..., 0], t2[..., 1]
        return jnp.stack([r1 * r2 - i1 * i2, r1 * i2 + i1 * r2], axis=-1)

    def cconj(t):
        return t * jnp.array([1.0, -1.0], t.dtype)

    def csum(x, y):
        return jnp.stack([x[..., 0] + y, x[..., 1]], axis=-1)

    def cdiv(x, y):
        a, b = x[..., 0], x[..., 1]
        c, d = y[..., 0], y[..., 1]
        cd2 = c * c + d * d
        return jnp.stack([(a * c + b * d) / cd2, (b * c - a * d) / cd2], axis=-1)

    a = alpha[..., None, None] / X.shape[2]                 # (N,1,1,1,1,1)
    _D = cconj(D)
    Z = cmul(Y, D) + a * X
    factor1 = Z / a
    numerator = jnp.sum(cmul(_D, Z), axis=2, keepdims=True)
    denominator = csum(a * jnp.sum(cmul(_D, D), axis=2, keepdims=True),
                       jnp.squeeze(a, -1) ** 2)
    factor2 = cmul(D, cdiv(numerator, denominator))
    Xf = jnp.mean(factor1 - factor2, axis=1)                # (N, C_in, Hf, Wf, 2)
    Xc = lax.complex(Xf[..., 0], Xf[..., 1])
    return jnp.fft.irfft2(Xc, s=(int(x_size[0]), int(x_size[1])), axes=(-2, -1))


# ----------------------------------- demo -------------------------------------

if __name__ == "__main__":
    N, C_in, C_out = 2, 4, 3
    x_size = (16, 16)                       # spatial output size
    Hf, Wf = x_size[0], x_size[1] // 2 + 1  # one-sided rFFT frequency grid

    key = jax.random.PRNGKey(0)
    kx, kd, ky, ka = jax.random.split(key, 4)
    X = jax.random.normal(kx, (N, 1, C_in, Hf, Wf, 2), jnp.float32)
    D = jax.random.normal(kd, (N, C_out, C_in, Hf, Wf, 2), jnp.float32)
    Y = jax.random.normal(ky, (N, C_out, 1, Hf, Wf, 2), jnp.float32)
    alpha = jax.random.uniform(ka, (N, 1, 1, 1), jnp.float32, 0.1, 1.0)

    fwd = jax.jit(functools.partial(solve_fft, x_size=x_size))
    out = jax.block_until_ready(fwd(X, D, Y, alpha))

    ref_fn = jax.jit(functools.partial(_solve_fft_reference, x_size=x_size))
    ref = jax.block_until_ready(ref_fn(X, D, Y, alpha))

    assert out.shape == (N, C_in, x_size[0], x_size[1]), out.shape
    assert bool(jnp.isfinite(out).all())
    err = float(jnp.max(jnp.abs(out - ref)))
    scale = max(1.0, float(jnp.max(jnp.abs(ref))))
    assert err <= 1e-3 * scale, (err, scale)
    print("KERNEL_OK")
</pallas_src>

<mosaic_0001>
module attributes {stable_mosaic.version = 11 : i64} {
  func.func @_solve_fft_kernel(%arg0: i32, %arg1: i32, %arg2: memref<2xf32, #tpu.memory_space<smem>>, %arg3: memref<1x2x4x8x128xf32, #tpu.memory_space<vmem>>, %arg4: memref<1x2x3x4x8x128xf32, #tpu.memory_space<vmem>>, %arg5: memref<1x2x3x8x128xf32, #tpu.memory_space<vmem>>, %arg6: memref<1x2x4x8x128xf32, #tpu.memory_space<vmem>>) attributes {dimension_semantics = [#tpu.dimension_semantics<parallel>, #tpu.dimension_semantics<parallel>], iteration_bounds = array<i64: 2, 1>, scalar_prefetch = 1 : i64, scratch_operands = 0 : i64, tpu.core_type = #tpu.core_type<tc>, window_params = [{transform_indices = @transform_0, window_bounds = array<i64: 1, 2, 4, 8, 128>}, {transform_indices = @transform_1, window_bounds = array<i64: 1, 2, 3, 4, 8, 128>}, {transform_indices = @transform_2, window_bounds = array<i64: 1, 2, 3, 8, 128>}, {transform_indices = @transform_3, window_bounds = array<i64: 1, 2, 4, 8, 128>}]} {
    %0 = arith.index_cast %arg0 : i32 to index
    %1 = memref.load %arg2[%0] : memref<2xf32, #tpu.memory_space<smem>>
    %cst = arith.constant 2.500000e-01 : f32
    %2 = arith.mulf %1, %cst : f32
    %cst_0 = arith.constant 1.000000e+00 : f32
    %3 = arith.divf %cst_0, %2 : f32
    %c0 = arith.constant 0 : index
    %c0_1 = arith.constant 0 : index
    %c0_2 = arith.constant 0 : index
    %c0_3 = arith.constant 0 : index
    %c0_4 = arith.constant 0 : index
    %4 = vector.load %arg3[%c0, %c0_1, %c0_2, %c0_3, %c0_4] : memref<1x2x4x8x128xf32, #tpu.memory_space<vmem>>, vector<1x1x4x8x128xf32>
    %5 = vector.shape_cast %4 : vector<1x1x4x8x128xf32> to vector<4x8x128xf32>
    %c0_5 = arith.constant 0 : index
    %c1 = arith.constant 1 : index
    %c0_6 = arith.constant 0 : index
    %c0_7 = arith.constant 0 : index
    %c0_8 = arith.constant 0 : index
    %6 = vector.load %arg3[%c0_5, %c1, %c0_6, %c0_7, %c0_8] : memref<1x2x4x8x128xf32, #tpu.memory_space<vmem>>, vector<1x1x4x8x128xf32>
    %7 = vector.shape_cast %6 : vector<1x1x4x8x128xf32> to vector<4x8x128xf32>
    %c0_9 = arith.constant 0 : index
    %c0_10 = arith.constant 0 : index
    %c0_11 = arith.constant 0 : index
    %c0_12 = arith.constant 0 : index
    %c0_13 = arith.constant 0 : index
    %c0_14 = arith.constant 0 : index
    %8 = vector.load %arg4[%c0_9, %c0_10, %c0_11, %c0_12, %c0_13, %c0_14] : memref<1x2x3x4x8x128xf32, #tpu.memory_space<vmem>>, vector<1x1x3x4x8x128xf32>
    %9 = vector.shape_cast %8 : vector<1x1x3x4x8x128xf32> to vector<3x4x8x128xf32>
    %c0_15 = arith.constant 0 : index
    %c1_16 = arith.constant 1 : index
    %c0_17 = arith.constant 0 : index
    %c0_18 = arith.constant 0 : index
    %c0_19 = arith.constant 0 : index
    %c0_20 = arith.constant 0 : index
    %10 = vector.load %arg4[%c0_15, %c1_16, %c0_17, %c0_18, %c0_19, %c0_20] : memref<1x2x3x4x8x128xf32, #tpu.memory_space<vmem>>, vector<1x1x3x4x8x128xf32>
    %11 = vector.shape_cast %10 : vector<1x1x3x4x8x128xf32> to vector<3x4x8x128xf32>
    %c0_21 = arith.constant 0 : index
    %c0_22 = arith.constant 0 : index
    %c0_23 = arith.constant 0 : index
    %c0_24 = arith.constant 0 : index
    %c0_25 = arith.constant 0 : index
    %12 = vector.load %arg5[%c0_21, %c0_22, %c0_23, %c0_24, %c0_25] : memref<1x2x3x8x128xf32, #tpu.memory_space<vmem>>, vector<1x1x3x8x128xf32>
    %13 = vector.shape_cast %12 : vector<1x1x3x8x128xf32> to vector<3x8x128xf32>
    %14 = vector.shape_cast %13 : vector<3x8x128xf32> to vector<3x1x8x128xf32>
    %c0_26 = arith.constant 0 : index
    %c1_27 = arith.constant 1 : index
    %c0_28 = arith.constant 0 : index
    %c0_29 = arith.constant 0 : index
    %c0_30 = arith.constant 0 : index
    %15 = vector.load %arg5[%c0_26, %c1_27, %c0_28, %c0_29, %c0_30] : memref<1x2x3x8x128xf32, #tpu.memory_space<vmem>>, vector<1x1x3x8x128xf32>
    %16 = vector.shape_cast %15 : vector<1x1x3x8x128xf32> to vector<3x8x128xf32>
    %17 = vector.shape_cast %16 : vector<3x8x128xf32> to vector<3x1x8x128xf32>
    %18 = vector.broadcast %14 : vector<3x1x8x128xf32> to vector<3x4x8x128xf32>
    %19 = arith.mulf %18, %9 : vector<3x4x8x128xf32>
    %20 = vector.broadcast %17 : vector<3x1x8x128xf32> to vector<3x4x8x128xf32>
    %21 = arith.mulf %20, %11 : vector<3x4x8x128xf32>
    %22 = arith.subf %19, %21 : vector<3x4x8x128xf32>
    %23 = vector.broadcast %2 : f32 to vector<4x8x128xf32>
    %24 = arith.mulf %23, %5 : vector<4x8x128xf32>
    %25 = vector.shape_cast %24 : vector<4x8x128xf32> to vector<1x4x8x128xf32>
    %26 = vector.broadcast %25 : vector<1x4x8x128xf32> to vector<3x4x8x128xf32>
    %27 = arith.addf %22, %26 : vector<3x4x8x128xf32>
    %28 = vector.broadcast %14 : vector<3x1x8x128xf32> to vector<3x4x8x128xf32>
    %29 = arith.mulf %28, %11 : vector<3x4x8x128xf32>
    %30 = vector.broadcast %17 : vector<3x1x8x128xf32> to vector<3x4x8x128xf32>
    %31 = arith.mulf %30, %9 : vector<3x4x8x128xf32>
    %32 = arith.addf %29, %31 : vector<3x4x8x128xf32>
    %33 = vector.broadcast %2 : f32 to vector<4x8x128xf32>
    %34 = arith.mulf %33, %7 : vector<4x8x128xf32>
    %35 = vector.shape_cast %34 : vector<4x8x128xf32> to vector<1x4x8x128xf32>
    %36 = vector.broadcast %35 : vector<1x4x8x128xf32> to vector<3x4x8x128xf32>
    %37 = arith.addf %32, %36 : vector<3x4x8x128xf32>
    %38 = arith.mulf %9, %27 : vector<3x4x8x128xf32>
    %39 = arith.mulf %11, %37 : vector<3x4x8x128xf32>
    %40 = arith.addf %38, %39 : vector<3x4x8x128xf32>
    %cst_31 = arith.constant dense<0.000000e+00> : vector<3x8x128xf32>
    %41 = vector.multi_reduction <add>, %40, %cst_31 [1] : vector<3x4x8x128xf32> to vector<3x8x128xf32>
    %42 = arith.mulf %9, %37 : vector<3x4x8x128xf32>
    %43 = arith.mulf %11, %27 : vector<3x4x8x128xf32>
    %44 = arith.subf %42, %43 : vector<3x4x8x128xf32>
    %cst_32 = arith.constant dense<0.000000e+00> : vector<3x8x128xf32>
    %45 = vector.multi_reduction <add>, %44, %cst_32 [1] : vector<3x4x8x128xf32> to vector<3x8x128xf32>
    %46 = arith.mulf %9, %9 : vector<3x4x8x128xf32>
    %47 = arith.mulf %11, %11 : vector<3x4x8x128xf32>
    %48 = arith.addf %46, %47 : vector<3x4x8x128xf32>
    %cst_33 = arith.constant dense<0.000000e+00> : vector<3x8x128xf32>
    %49 = vector.multi_reduction <add>, %48, %cst_33 [1] : vector<3x4x8x128xf32> to vector<3x8x128xf32>
    %50 = vector.broadcast %2 : f32 to vector<3x8x128xf32>
    %51 = arith.mulf %50, %49 : vector<3x8x128xf32>
    %52 = arith.mulf %2, %2 : f32
    %53 = vector.broadcast %52 : f32 to vector<3x8x128xf32>
    %54 = arith.addf %51, %53 : vector<3x8x128xf32>
    %55 = tpu.reciprocal %54 {approx = true} : vector<3x8x128xf32> -> vector<3x8x128xf32>
    %56 = arith.mulf %54, %55 : vector<3x8x128xf32>
    %cst_34 = arith.constant 2.000000e+00 : f32
    %57 = vector.broadcast %cst_34 : f32 to vector<3x8x128xf32>
    %58 = arith.subf %57, %56 : vector<3x8x128xf32>
    %59 = arith.mulf %55, %58 : vector<3x8x128xf32>
    %60 = arith.mulf %41, %59 : vector<3x8x128xf32>
    %61 = vector.shape_cast %60 : vector<3x8x128xf32> to vector<3x1x8x128xf32>
    %62 = arith.mulf %45, %59 : vector<3x8x128xf32>
    %63 = vector.shape_cast %62 : vector<3x8x128xf32> to vector<3x1x8x128xf32>
    %64 = vector.broadcast %3 : f32 to vector<3x4x8x128xf32>
    %65 = arith.mulf %27, %64 : vector<3x4x8x128xf32>
    %66 = vector.broadcast %61 : vector<3x1x8x128xf32> to vector<3x4x8x128xf32>
    %67 = arith.mulf %9, %66 : vector<3x4x8x128xf32>
    %68 = vector.broadcast %63 : vector<3x1x8x128xf32> to vector<3x4x8x128xf32>
    %69 = arith.mulf %11, %68 : vector<3x4x8x128xf32>
    %70 = arith.subf %67, %69 : vector<3x4x8x128xf32>
    %71 = arith.subf %65, %70 : vector<3x4x8x128xf32>
    %72 = vector.broadcast %3 : f32 to vector<3x4x8x128xf32>
    %73 = arith.mulf %37, %72 : vector<3x4x8x128xf32>
    %74 = vector.broadcast %63 : vector<3x1x8x128xf32> to vector<3x4x8x128xf32>
    %75 = arith.mulf %9, %74 : vector<3x4x8x128xf32>
    %76 = vector.broadcast %61 : vector<3x1x8x128xf32> to vector<3x4x8x128xf32>
    %77 = arith.mulf %11, %76 : vector<3x4x8x128xf32>
    %78 = arith.addf %75, %77 : vector<3x4x8x128xf32>
    %79 = arith.subf %73, %78 : vector<3x4x8x128xf32>
    %cst_35 = arith.constant dense<0.000000e+00> : vector<4x8x128xf32>
    %80 = vector.multi_reduction <add>, %71, %cst_35 [0] : vector<3x4x8x128xf32> to vector<4x8x128xf32>
    %cst_36 = arith.constant 0.333333343 : f32
    %81 = vector.broadcast %cst_36 : f32 to vector<4x8x128xf32>
    %82 = arith.mulf %80, %81 : vector<4x8x128xf32>
    %c0_37 = arith.constant 0 : index
    %c0_38 = arith.constant 0 : index
    %c0_39 = arith.constant 0 : index
    %c0_40 = arith.constant 0 : index
    %c0_41 = arith.constant 0 : index
    %83 = vector.load %arg6[%c0_37, %c0_38, %c0_39, %c0_40, %c0_41] : memref<1x2x4x8x128xf32, #tpu.memory_space<vmem>>, vector<1x1x4x8x128xf32>
    %84 = vector.shape_cast %83 : vector<1x1x4x8x128xf32> to vector<4x8x128xf32>
    %85 = vector.shape_cast %82 : vector<4x8x128xf32> to vector<1x1x4x8x128xf32>
    tpu.vector_store %arg6[%c0_37, %c0_38, %c0_39, %c0_40, %c0_41], %85 {strides = array<i32>} : memref<1x2x4x8x128xf32, #tpu.memory_space<vmem>>, vector<1x1x4x8x128xf32>,
    %cst_42 = arith.constant dense<0.000000e+00> : vector<4x8x128xf32>
    %86 = vector.multi_reduction <add>, %79, %cst_42 [0] : vector<3x4x8x128xf32> to vector<4x8x128xf32>
    %cst_43 = arith.constant 0.333333343 : f32
    %87 = vector.broadcast %cst_43 : f32 to vector<4x8x128xf32>
    %88 = arith.mulf %86, %87 : vector<4x8x128xf32>
    %c0_44 = arith.constant 0 : index
    %c1_45 = arith.constant 1 : index
    %c0_46 = arith.constant 0 : index
    %c0_47 = arith.constant 0 : index
    %c0_48 = arith.constant 0 : index
    %89 = vector.load %arg6[%c0_44, %c1_45, %c0_46, %c0_47, %c0_48] : memref<1x2x4x8x128xf32, #tpu.memory_space<vmem>>, vector<1x1x4x8x128xf32>
    %90 = vector.shape_cast %89 : vector<1x1x4x8x128xf32> to vector<4x8x128xf32>
    %91 = vector.shape_cast %88 : vector<4x8x128xf32> to vector<1x1x4x8x128xf32>
    tpu.vector_store %arg6[%c0_44, %c1_45, %c0_46, %c0_47, %c0_48], %91 {strides = array<i32>} : memref<1x2x4x8x128xf32, #tpu.memory_space<vmem>>, vector<1x1x4x8x128xf32>,
    return
  }
  func.func @transform_0(%arg0: i32, %arg1: i32, %arg2: memref<2xf32, #tpu.memory_space<smem>>) -> (i32, i32, i32, i32, i32) {
    %c0_i32 = arith.constant 0 : i32
    %c0_i32_0 = arith.constant 0 : i32
    %c0_i32_1 = arith.constant 0 : i32
    %c0_i32_2 = arith.constant 0 : i32
    return %arg0, %c0_i32, %c0_i32_0, %c0_i32_1, %arg1 : i32, i32, i32, i32, i32
  }
  func.func @transform_1(%arg0: i32, %arg1: i32, %arg2: memref<2xf32, #tpu.memory_space<smem>>) -> (i32, i32, i32, i32, i32, i32) {
    %c0_i32 = arith.constant 0 : i32
    %c0_i32_0 = arith.constant 0 : i32
    %c0_i32_1 = arith.constant 0 : i32
    %c0_i32_2 = arith.constant 0 : i32
    %c0_i32_3 = arith.constant 0 : i32
    return %arg0, %c0_i32, %c0_i32_0, %c0_i32_1, %c0_i32_2, %arg1 : i32, i32, i32, i32, i32, i32
  }
  func.func @transform_2(%arg0: i32, %arg1: i32, %arg2: memref<2xf32, #tpu.memory_space<smem>>) -> (i32, i32, i32, i32, i32) {
    %c0_i32 = arith.constant 0 : i32
    %c0_i32_0 = arith.constant 0 : i32
    %c0_i32_1 = arith.constant 0 : i32
    %c0_i32_2 = arith.constant 0 : i32
    return %arg0, %c0_i32, %c0_i32_0, %c0_i32_1, %arg1 : i32, i32, i32, i32, i32
  }
  func.func @transform_3(%arg0: i32, %arg1: i32, %arg2: memref<2xf32, #tpu.memory_space<smem>>) -> (i32, i32, i32, i32, i32) {
    %c0_i32 = arith.constant 0 : i32
    %c0_i32_0 = arith.constant 0 : i32
    %c0_i32_1 = arith.constant 0 : i32
    %c0_i32_2 = arith.constant 0 : i32
    return %arg0, %c0_i32, %c0_i32_0, %c0_i32_1, %arg1 : i32, i32, i32, i32, i32
  }
}

</mosaic_0001>

<bundles_post_ra>
// kernel: reverse.0
= control target key start
LH: loop header
LB: loop body
LE: loop exit
PB: predicated region body
PF: predicated region fallthrough
CT: control target
= control target key end

     0   :  { %v72_v3 = vlaneseq  ;;  %v65_v6 = vld [vmem:[#allocation0 + $0x7] ss:$-1 sm:$0xff]  ;;  %v79_v8 = vld [vmem:[#allocation0 + $0x17] ss:$-1 sm:$0xff]  ;;  %s331_s0 = inlined_call_operand.vmem [shape: f32[2,4,16,7], index: 0, kind: input, shape index: {}]   ;;  %s332_s1 = inlined_call_operand.vmem [shape: f32[2,4,16,7], index: 1, kind: output, shape index: {}]  }
   0x1   :  { %v45_v0 = vld [vmem:[%s331_s0] sm:$0xff]  ;;  %v47_v1 = vld [vmem:[%s331_s0 + $0x8] sm:$0xff]  ;;  %v49_v2 = vld [vmem:[%s331_s0 + $0x10] sm:$0xff]  ;;  %v66_v12 = vrot.slane %v65_v6, 1  ;;  %v80_v13 = vrot.slane %v79_v8, 1 }
   0x2   :  { %46 = vst [vmem:[#allocation0 + $0x8] sm:$0xff] %v45_v0  ;;  %v51_v4 = vld [vmem:[%s331_s0 + $0x18] sm:$0xff]  ;;  %v53_v5 = vld [vmem:[%s331_s0 + $0x20] sm:$0xff]  ;;  %v55_v7 = vld [vmem:[%s331_s0 + $0x28] sm:$0xff]  ;;  %v73_v10 = vshrl.u32 %v72_v3, 7 }
   0x3   :  { %48 = vst [vmem:[#allocation0 + $0x18] sm:$0xff] %v47_v1  ;;  %v57_v9 = vld [vmem:[%s331_s0 + $0x30] sm:$0xff]  ;;  %v59_v11 = vld [vmem:[%s331_s0 + $0x38] sm:$0xff]  ;;  %v93_v14 = vld [vmem:[#allocation0 + $0x27] ss:$-1 sm:$0xff] }
   0x4   :  { %50 = vst [vmem:[#allocation0 + $0x28] sm:$0xff] %v49_v2  ;;  %vm74_vm0 = vcmp.lt.s32.totalorder %v73_v10, 7  ;;  %v107_v16 = vld [vmem:[#allocation0 + $0x37] ss:$-1 sm:$0xff]  ;;  %v94_v19 = vrot.slane %v93_v14, 1 }
   0x5   :  { %52 = vst [vmem:[#allocation0 + $0x38] sm:$0xff] %v51_v4  ;;  %v121_v22 = vld [vmem:[#allocation0 + $0x47] ss:$-1 sm:$0xff]  ;;  %v108_v24 = vrot.slane %v107_v16, 1  ;;  %v135_v28 = vld [vmem:[#allocation0 + $0x57] ss:$-1 sm:$0xff] }
   0x6   :  { %54 = vst [vmem:[#allocation0 + $0x48] sm:$0xff] %v53_v5  ;;  %v122_v29 = vrot.slane %v121_v22, 1  ;;  %v149_v32 = vld [vmem:[#allocation0 + $0x67] ss:$-1 sm:$0xff]  ;;  %v136_v33 = vrot.slane %v135_v28, 1 }
   0x7   :  { %56 = vst [vmem:[#allocation0 + $0x58] sm:$0xff] %v55_v7  ;;  %v163_v36 = vld [vmem:[#allocation0 + $0x77] ss:$-1 sm:$0xff]  ;;  %v150_v37 = vrot.slane %v149_v32, 1 }
   0x8   :  { %58 = vst [vmem:[#allocation0 + $0x68] sm:$0xff] %v57_v9  ;;  %v164_v40 = vrot.slane %v163_v36, 1 }
   0x9   :  { %60 = vst [vmem:[#allocation0 + $0x78] sm:$0xff] %v59_v11  ;;  %v70_v15 = vld [vmem:[#allocation0 + $0xf] ss:$-1 sm:$0xff] }
   0xa   :  { %67 = vst [vmem:[#allocation1] sm:$0xff] %v66_v12  ;;  %v71_v17 = vrot.slane %v70_v15, 1  ;;  %v84_v18 = vld [vmem:[#allocation0 + $0x1f] ss:$-1 sm:$0xff] }
   0xb   :  { %81 = vst [vmem:[#allocation1 + $0x8] sm:$0xff] %v80_v13  ;;  %v85_v20 = vrot.slane %v84_v18, 1  ;;  %v98_v21 = vld [vmem:[#allocation0 + $0x2f] ss:$-1 sm:$0xff] }
   0xc   :  { %75 = vst.msk [vmem:[#allocation1] sm:$0xff] %vm74_vm0, %v71_v17  ;;  %v99_v23 = vrot.slane %v98_v21, 1  ;;  %v112_v25 = vld [vmem:[#allocation0 + $0x3f] ss:$-1 sm:$0xff] }
   0xd   :  { %89 = vst.msk [vmem:[#allocation1 + $0x8] sm:$0xff] %vm74_vm0, %v85_v20  ;;  %v113_v26 = vrot.slane %v112_v25, 1  ;;  %v126_v27 = vld [vmem:[#allocation0 + $0x4f] ss:$-1 sm:$0xff] }
   0xe   :  { %95 = vst [vmem:[#allocation1 + $0x10] sm:$0xff] %v94_v19  ;;  %v140_v30 = vld [vmem:[#allocation0 + $0x5f] ss:$-1 sm:$0xff]  ;;  %v127_v31 = vrot.slane %v126_v27, 1 }
   0xf   :  { %103 = vst.msk [vmem:[#allocation1 + $0x10] sm:$0xff] %vm74_vm0, %v99_v23  ;;  %v154_v34 = vld [vmem:[#allocation0 + $0x6f] ss:$-1 sm:$0xff]  ;;  %v141_v35 = vrot.slane %v140_v30, 1 }
  0x10   :  { %109 = vst [vmem:[#allocation1 + $0x18] sm:$0xff] %v108_v24  ;;  %v168_v38 = vld [vmem:[#allocation0 + $0x7f] ss:$-1 sm:$0xff]  ;;  %v155_v39 = vrot.slane %v154_v34, 1 }
  0x11   :  { %117 = vst.msk [vmem:[#allocation1 + $0x18] sm:$0xff] %vm74_vm0, %v113_v26  ;;  %v169_v41 = vrot.slane %v168_v38, 1 }
  0x12   :  { %123 = vst [vmem:[#allocation1 + $0x20] sm:$0xff] %v122_v29 }
  0x13   :  { %131 = vst.msk [vmem:[#allocation1 + $0x20] sm:$0xff] %vm74_vm0, %v127_v31  ;;  %v216_v42 = vld [vmem:[#allocation1] sm:$0xff] }
  0x14   :  { %137 = vst [vmem:[#allocation1 + $0x28] sm:$0xff] %v136_v33  ;;  %v218_v43 = vld [vmem:[#allocation1 + $0x8] sm:$0xff] }
  0x15   :  { %145 = vst.msk [vmem:[#allocation1 + $0x28] sm:$0xff] %vm74_vm0, %v141_v35 }
  0x16   :  { %151 = vst [vmem:[#allocation1 + $0x30] sm:$0xff] %v150_v37  ;;  %v220_v44 = vld [vmem:[#allocation1 + $0x10] sm:$0xff] }
  0x17   :  { %159 = vst.msk [vmem:[#allocation1 + $0x30] sm:$0xff] %vm74_vm0, %v155_v39 }
  0x18   :  { %165 = vst [vmem:[#allocation1 + $0x38] sm:$0xff] %v164_v40  ;;  %v222_v45 = vld [vmem:[#allocation1 + $0x18] sm:$0xff] }
  0x19   :  { %173 = vst.msk [vmem:[#allocation1 + $0x38] sm:$0xff] %vm74_vm0, %v169_v41 }
  0x1a   :  { %217 = vst [vmem:[%s332_s1] sm:$0xff] %v216_v42  ;;  %v224_v46 = vld [vmem:[#allocation1 + $0x20] sm:$0xff] }
  0x1b   :  { %219 = vst [vmem:[%s332_s1 + $0x8] sm:$0xff] %v218_v43 }
  0x1c   :  { %221 = vst [vmem:[%s332_s1 + $0x10] sm:$0xff] %v220_v44  ;;  %v226_v47 = vld [vmem:[#allocation1 + $0x28] sm:$0xff] }
  0x1d   :  { %223 = vst [vmem:[%s332_s1 + $0x18] sm:$0xff] %v222_v45 }
  0x1e   :  { %225 = vst [vmem:[%s332_s1 + $0x20] sm:$0xff] %v224_v46  ;;  %v228_v48 = vld [vmem:[#allocation1 + $0x30] sm:$0xff] }
  0x1f   :  { %227 = vst [vmem:[%s332_s1 + $0x28] sm:$0xff] %v226_v47 }
  0x20   :  { %229 = vst [vmem:[%s332_s1 + $0x30] sm:$0xff] %v228_v48  ;;  %v230_v49 = vld [vmem:[#allocation1 + $0x38] sm:$0xff] }
  0x21   :  { %231 = vst [vmem:[%s332_s1 + $0x38] sm:$0xff] %v230_v49 }

// kernel: solve_fft.1
= control target key start
LH: loop header
LB: loop body
LE: loop exit
PB: predicated region body
PF: predicated region fallthrough
CT: control target
= control target key end

     0   :  { %s984_s18 = smov [#allocation3]   ;;  %s1773_s0 = inlined_call_operand.vmem [shape: f32[2], index: 0, kind: input, shape index: {}]   ;;  %s1774_s1 = inlined_call_operand.vmem [shape: f32[2,2,4,8,128], index: 1, kind: input, shape index: {}]   ;;  %s1775_s2 = inlined_call_operand.vmem [shape: f32[2,2,3,4,8,128], index: 2, kind: input, shape index: {}]   ;;  %s1776_s3 = inlined_call_operand.vmem [shape: f32[2,2,3,8,128], index: 3, kind: input, shape index: {}]   ;;  %s1777_s4 = inlined_call_operand.vmem [shape: f32[2,2,4,8,128], index: 4, kind: output, shape index: {}]  }
   0x1   :  { %s10_s17 = sshll.u32 %s1773_s0, 4  ;;  %s11_s17 = int_to_ptr.vmem [resolvable:$true] %s10_s17 }
   0x2   :  { %13 = dma.vmem_to_smem %s11_s17, 16, %s984_s18, [#allocation2] }
   0x3   :  { %970 = dma.done.wait [#allocation2], 16 }
   0x4   :  { %971 = vsyncadd [#allocation2], 4294967280 }
   0x5   :  { %16 = sfence }
   0x6   :  { %s1013_s19 = smov 0   ;;  %s1015_s20 = smov 0  }
   0x7   :  { %s1017_s21 = smov 0  }
   0x8 LB: > { %s34_s0 = sadd.s32 1, %s978_s20  ;;  %p875_p0 = scmp.ge.s32.totalorder %s982_s21, 1  ;;  %s982_s21 = sphi %s1017_s21, %s22_s21   ;;  %s978_s20 = sphi %s1015_s20, %s2092_s20   ;;  %s974_s19 = sphi %s1013_s19, %s2091_s19  }
   0x9   : > { %p36_p1 = scmp.ge.s32.totalorder %s34_s0, 2  ;;  %p195_p2 = scmp.lt.s32.totalorder %s982_s21, 3 }
   0xb   : > { %s2094_s0 = smov (%p36_p1, %s34_s0), 0  ;;  %p196_p3 = pnand %p875_p0, %p195_p2 }
   0xd   : > { %199 = sbr.rel (%p196_p3) target bundleno = 161 (0xa1), region = 32 }
  0x12   : > { %s273_s22 = sld [smem:[#allocation3 + %s974_s19]]  ;;  %p241_p4 = scmp.lt.s32.totalorder %s974_s19, 1 }
  0x14   : > { %s2096_s19 = smov (!%p241_p4, %s974_s19), 1 }
  0x15   : > { %s909_s24 = smul.u32 192, %s2096_s19  ;;  %s907_s6 = sshll.u32 %s2096_s19, 6 }
  0x16   : > { %s910_s28 = smul.u32 48, %s2096_s19  ;;  %s1194_s9 = scalar_lea.vmem %s1774_s1, %s907_s6 }
  0x17   : > { %s1047_s27 = scalar_lea.vmem %s1775_s2, %s909_s24  ;;  %s272_s14 = scalar_lea.vmem %s1777_s4, %s907_s6 }
  0x18   : > { %s1031_s23 = smul.f32 0.25, %s273_s22  ;;  %v1051_v10 = vld [vmem:[%s1047_s27] sm:$0xff]  ;;  %v1054_v11 = vld [vmem:[%s1047_s27 + $0x8] sm:$0xff]  ;;  %s1071_s5 = scalar_lea.vmem %s1776_s3, %s910_s28  ;;  %v1074_v17 = vld [vmem:[%s1047_s27 + $0x10] sm:$0xff] }
  0x19   : > { %1877 = vst [vmem:[#allocation6_spill] sm:$0xff] %v1051_v10  ;;  %v1057_v12 = vld [vmem:[%s1047_s27 + $0x20] sm:$0xff]  ;;  %v1060_v14 = vld [vmem:[%s1047_s27 + $0x28] sm:$0xff]  ;;  %v1077_v18 = vld [vmem:[%s1047_s27 + $0x30] sm:$0xff]  ;;  %v1102_v26 = vmul.f32 %v1051_v10, %v1051_v10  ;;  %v1106_v27 = vmul.f32 %v1054_v11, %v1054_v11  ;;  %v1142_v37 = vmul.f32 %v1074_v17, %v1074_v17 }
  0x1a   : > { %v1034_v0 = vstv %s1031_s23  ;;  %1878 = vst [vmem:[#allocation7_spill] sm:$0xff] %v1054_v11  ;;  %v1063_v15 = vld [vmem:[%s1047_s27 + $0x40] sm:$0xff]  ;;  %v1066_v16 = vld [vmem:[%s1047_s27 + $0x48] sm:$0xff]  ;;  %v1080_v19 = vld [vmem:[%s1047_s27 + $0x50] sm:$0xff]  ;;  %v1119_v31 = vmul.f32 %v1057_v12, %v1057_v12  ;;  %v1123_v32 = vmul.f32 %v1060_v14, %v1060_v14  ;;  %v1146_v38 = vmul.f32 %v1077_v18, %v1077_v18  ;;  %s575_s10 = smul.f32 %s1031_s23, %s1031_s23 }
  0x1b   : > { %1876 = vst [vmem:[#allocation5_spill] sm:$0xff] %v1034_v0  ;;  %938 = vrcp.f32 %v1034_v0  ;;  %v287_v3 = vand.u32 2147483648, %v1034_v0  ;;  %vm281_vm0 = vweird.f32 %v1034_v0  ;;  %v285_v5 = vand.u32 2147483647, %v1034_v0  ;;  %v1083_v20 = vld [vmem:[%s1047_s27 + $0x60] sm:$0xff]  ;;  %v1086_v21 = vld [vmem:[%s1047_s27 + $0x68] sm:$0xff] }
  0x1c   : > { %1879 = vst [vmem:[#allocation8_spill] sm:$0xff] %v1057_v12  ;;  %v1089_v22 = vld [vmem:[%s1047_s27 + $0x70] sm:$0xff]  ;;  %v1092_v23 = vld [vmem:[%s1047_s27 + $0x18] sm:$0xff]  ;;  %v1095_v24 = vld [vmem:[%s1047_s27 + $0x80] sm:$0xff]  ;;  %v1127_v33 = vmul.f32 %v1063_v15, %v1063_v15  ;;  %v1131_v34 = vmul.f32 %v1066_v16, %v1066_v16  ;;  %v1150_v39 = vmul.f32 %v1080_v19, %v1080_v19  ;;  %v1154_v40 = vmul.f32 %v1083_v20, %v1083_v20 }
  0x1d   : > { %v288_v7 = vor.u32 1.1754944e-38, %v287_v3  ;;  %vm286_vm3 = vcmp.eq.f32.partialorder %v285_v5, 8.507059e+37  ;;  %1880 = vst [vmem:[#allocation9_spill] sm:$0xff] %v1060_v14  ;;  %v1098_v25 = vld [vmem:[%s1047_s27 + $0x88] sm:$0xff]  ;;  %v1109_v28 = vld [vmem:[%s1047_s27 + $0x38] sm:$0xff]  ;;  %v1115_v30 = vld [vmem:[%s1071_s5] sm:$0xff]  ;;  %v1161_v42 = vmul.f32 %v1086_v21, %v1086_v21  ;;  %v1165_v43 = vmul.f32 %v1089_v22, %v1089_v22 }
  0x1e   : > { %1881 = vst [vmem:[#allocation10_spill] sm:$0xff] %v1063_v15  ;;  %v1112_v29 = vld [vmem:[%s1047_s27 + $0x58] sm:$0xff]  ;;  %v1135_v35 = vld [vmem:[%s1071_s5 + $0x8] sm:$0xff]  ;;  %v1138_v36 = vld [vmem:[%s1071_s5 + $0x10] sm:$0xff]  ;;  %v1169_v44 = vmul.f32 %v1095_v24, %v1095_v24  ;;  %v1173_v45 = vmul.f32 %v1098_v25, %v1098_v25  ;;  %v332_v46 = vmul.f32 %v1115_v30, %v1051_v10  ;;  %v1179_v47 = vmul.f32 %v1092_v23, %v1092_v23 }
  0x1f   : > { %1882 = vst [vmem:[#allocation11_spill] sm:$0xff] %v1066_v16  ;;  %v1157_v41 = vld [vmem:[%s1071_s5 + $0x18] sm:$0xff]  ;;  %v1183_v48 = vmul.f32 %v1109_v28, %v1109_v28  ;;  %v1187_v49 = vmul.f32 %v1112_v29, %v1112_v29  ;;  %v1197_v50 = vld [vmem:[%s1071_s5 + $0x20] sm:$0xff]  ;;  %v333_v51 = vmul.f32 %v1115_v30, %v1054_v11  ;;  %v336_v52 = vmul.f32 %v1135_v35, %v1057_v12  ;;  %v1211_v56 = vld [vmem:[%s1047_s27 + $0x90] sm:$0xff] }
  0x20   : > { %1883 = vst [vmem:[#allocation12_spill] sm:$0xff] %v1074_v17  ;;  %v337_v53 = vmul.f32 %v1135_v35, %v1060_v14  ;;  %v340_v54 = vmul.f32 %v1138_v36, %v1063_v15  ;;  %v1208_v55 = vld [vmem:[%s1047_s27 + $0x78] sm:$0xff]  ;;  %v1214_v57 = vld [vmem:[%s1071_s5 + $0x28] sm:$0xff]  ;;  %v334_v58 = vmul.f32 %v1115_v30, %v1074_v17  ;;  %v338_v59 = vmul.f32 %v1135_v35, %v1077_v18  ;;  %v1228_v63 = vld [vmem:[%s1047_s27 + $0xa0] sm:$0xff] }
  0x21   : > { %v939_v1 = vpop.eup %938  ;;  %1884 = vst [vmem:[#allocation13_spill] sm:$0xff] %v1077_v18  ;;  %v341_v60 = vmul.f32 %v1138_v36, %v1066_v16  ;;  %v344_v61 = vmul.f32 %v1157_v41, %v1083_v20  ;;  %v1225_v62 = vld [vmem:[%s1047_s27 + $0x98] sm:$0xff]  ;;  %v345_v3 = vmul.f32 %v1157_v41, %v1086_v21  ;;  %v347_v5 = vmul.f32 %v1157_v41, %v1208_v55 }
  0x22   : > { %v277_v2 = vmul.f32 %v939_v1, %v1034_v0  ;;  %vm282_vm1 = vweird.f32 %v939_v1  ;;  %1885 = vst [vmem:[#allocation14_spill] sm:$0xff] %v1080_v19 }
  0x23   : > { %vm283_vm2 = vmor %vm281_vm0, %vm282_vm1  ;;  %1886 = vst [vmem:[#allocation15_spill] sm:$0xff] %v1083_v20 }
  0x24   : > { %v278_v4 = vsub.f32 1.0, %v277_v2  ;;  %1887 = vst [vmem:[#allocation16_spill] sm:$0xff] %v1086_v21  ;;  %v335_v2 = vmul.f32 %v1115_v30, %v1092_v23 }
  0x25   : > { %1888 = vst [vmem:[#allocation17_spill] sm:$0xff] %v1089_v22 }
  0x26   : > { %v279_v6 = vmul.f32 %v939_v1, %v278_v4  ;;  %1889 = vst [vmem:[#allocation18_spill] sm:$0xff] %v1092_v23  ;;  %v346_v4 = vmul.f32 %v1157_v41, %v1089_v22 }
  0x27   : > { %1890 = vst [vmem:[#allocation19_spill] sm:$0xff] %v1095_v24 }
  0x28   : > { %v280_v8 = vadd.f32 %v939_v1, %v279_v6  ;;  %1891 = vst [vmem:[#allocation20_spill] sm:$0xff] %v1098_v25  ;;  %v291_v6 = vld [vmem:[%s1194_s9] sm:$0xff] }
  0x29   : > { %1892 = vst [vmem:[#allocation21_spill] sm:$0xff] %v1102_v26  ;;  %v369_v26 = vmul.f32 %v291_v6, %v1034_v0 }
  0x2a   : > { %v284_v9 = vsel %vm283_vm2, %v939_v1, %v280_v8  ;;  %1893 = vst [vmem:[#allocation22_spill] sm:$0xff] %v1106_v27  ;;  %v1231_v1 = vld [vmem:[%s1047_s27 + $0xa8] sm:$0xff]  ;;  %v1246_v8 = vld [vmem:[%s1047_s27 + $0xb8] sm:$0xff]  ;;  %v358_v27 = vsub.f32 %v334_v58, %v346_v4 }
  0x2b   : > { %v289_v13 = vsel %vm286_vm3, %v288_v7, %v284_v9  ;;  %1894 = vst [vmem:[#allocation23_spill] sm:$0xff] %v1109_v28  ;;  %v1243_v7 = vld [vmem:[%s1047_s27 + $0xb0] sm:$0xff]  ;;  %v1250_v9 = vmul.f32 %v1138_v36, %v1080_v19 }
  0x2c   : > { %911 = vpush %v289_v13  ;;  %v348_v13 = vmul.f32 %v1197_v50, %v1095_v24 }
  0x2d   : > { %1895 = vst [vmem:[#allocation24_spill] sm:$0xff] %v1112_v29  ;;  %v1933_v6 = vld [vmem:[#allocation18_spill] sm:$0xff] }
  0x2e   : > { %1896 = vst [vmem:[#allocation25_spill] sm:$0xff] %v1119_v31  ;;  %v356_v31 = vsub.f32 %v332_v46, %v344_v61  ;;  %v1931_v61 = vld [vmem:[#allocation10_spill] sm:$0xff] }
  0x2f   : > { %1897 = vst [vmem:[#allocation26_spill] sm:$0xff] %v1123_v32  ;;  %v352_v32 = vmul.f32 %v1214_v57, %v1228_v63 }
  0x30   : > { %1898 = vst [vmem:[#allocation27_spill] sm:$0xff] %v1127_v33  ;;  %v294_v33 = vld [vmem:[%s1194_s9 + $0x18] sm:$0xff] }
  0x31   : > { %1899 = vst [vmem:[#allocation28_spill] sm:$0xff] %v1131_v34  ;;  %v293_v34 = vld [vmem:[%s1194_s9 + $0x10] sm:$0xff]  ;;  %v372_v18 = vmul.f32 %v294_v33, %v1034_v0  ;;  %v364_v17 = vsub.f32 %v340_v54, %v352_v32  ;;  %v385_v33 = vmul.f32 %v1083_v20, %v1115_v30  ;;  %v387_v32 = vmul.f32 %v1089_v22, %v1115_v30 }
  0x32   : > { %1900 = vst [vmem:[#allocation29_spill] sm:$0xff] %v1142_v37  ;;  %v1275_v37 = vmul.f32 %v1214_v57, %v1243_v7 }
  0x33   : > { %1901 = vst [vmem:[#allocation30_spill] sm:$0xff] %v1146_v38  ;;  %v1265_v38 = vmul.f32 %v1138_v36, %v1112_v29  ;;  %v360_v29 = vsub.f32 %v336_v52, %v348_v13  ;;  %v1291_v52 = vmul.f32 %v1208_v55, %v1208_v55 }
  0x34   : > { %1902 = vst [vmem:[#allocation31_spill] sm:$0xff] %v1150_v39  ;;  %v350_v39 = vmul.f32 %v1197_v50, %v1211_v56  ;;  %v366_v46 = vsub.f32 %v1250_v9, %v1275_v37  ;;  %v1934_v9 = vld [vmem:[#allocation13_spill] sm:$0xff]  ;;  %v1937_v22 = vld [vmem:[#allocation24_spill] sm:$0xff] }
  0x35   : > { %1903 = vst [vmem:[#allocation32_spill] sm:$0xff] %v1154_v40  ;;  %v359_v40 = vsub.f32 %v335_v2, %v347_v5  ;;  %v405_v2 = vmul.f32 %v1214_v57, %v1931_v61  ;;  %v396_v5 = vmul.f32 %v1246_v8, %v1138_v36  ;;  %v403_v13 = vmul.f32 %v1197_v50, %v1934_v9 }
  0x36   : > { %1904 = vst [vmem:[#allocation33_spill] sm:$0xff] %v1161_v42  ;;  %v357_v42 = vsub.f32 %v333_v51, %v345_v3  ;;  %v362_v16 = vsub.f32 %v338_v59, %v350_v39  ;;  %v1930_v59 = vld [vmem:[#allocation12_spill] sm:$0xff]  ;;  %v1932_v3 = vld [vmem:[#allocation11_spill] sm:$0xff] }
  0x37   : > { %1905 = vst [vmem:[#allocation34_spill] sm:$0xff] %v1165_v43  ;;  %v353_v43 = vmul.f32 %v1214_v57, %v1231_v1  ;;  %v406_v4 = vmul.f32 %v1214_v57, %v1932_v3 }
  0x38   : > { %1906 = vst [vmem:[#allocation35_spill] sm:$0xff] %v1169_v44  ;;  %v1279_v44 = vmul.f32 %v1214_v57, %v1246_v8 }
  0x39   : > { %1907 = vst [vmem:[#allocation36_spill] sm:$0xff] %v1173_v45  ;;  %v351_v45 = vmul.f32 %v1197_v50, %v1225_v62 }
  0x3a   : > { %1908 = vst [vmem:[#allocation37_spill] sm:$0xff] %v1179_v47  ;;  %v339_v47 = vmul.f32 %v1135_v35, %v1109_v28  ;;  %v371_v28 = vmul.f32 %v293_v34, %v1034_v0  ;;  %v367_v51 = vsub.f32 %v1265_v38, %v1279_v44  ;;  %v386_v34 = vmul.f32 %v1086_v21, %v1115_v30 }
  0x3b   : > { %1909 = vst [vmem:[#allocation38_spill] sm:$0xff] %v1183_v48  ;;  %v292_v48 = vld [vmem:[%s1194_s9 + $0x8] sm:$0xff]  ;;  %v1305_v38 = vadd.f32 %v372_v18, %v359_v40  ;;  %v389_v40 = vmul.f32 %v1095_v24, %v1135_v35 }
  0x3c   : > { %1910 = vst [vmem:[#allocation39_spill] sm:$0xff] %v1187_v49  ;;  %v349_v49 = vmul.f32 %v1197_v50, %v1098_v25  ;;  %v370_v19 = vmul.f32 %v292_v48, %v1034_v0  ;;  %v363_v15 = vsub.f32 %v339_v47, %v351_v45  ;;  %v1293_v48 = vadd.f32 %v369_v26, %v356_v31 }
  0x3d   : > { %1911 = vst [vmem:[#allocation40_spill] sm:$0xff] %v1208_v55  ;;  %v1303_v37 = vadd.f32 %v371_v28, %v358_v27  ;;  %v1311_v31 = vadd.f32 %v371_v28, %v362_v16  ;;  %v1315_v47 = vadd.f32 %v369_v26, %v364_v17  ;;  %v388_v27 = vmul.f32 %v1208_v55, %v1115_v30 }
  0x3e   : > { %1912 = vst [vmem:[#allocation41_spill] sm:$0xff] %v1211_v56  ;;  %v361_v23 = vsub.f32 %v337_v53, %v349_v49  ;;  %v1301_v39 = vadd.f32 %v370_v19, %v357_v42  ;;  %v1313_v45 = vadd.f32 %v372_v18, %v363_v15  ;;  %v391_v16 = vmul.f32 %v1211_v56, %v1135_v35  ;;  %v882_v42 = vld [vmem:[%s1194_s9 + $0x20] sm:$0xff]  ;;  %v883_v53 = vld [vmem:[%s1194_s9 + $0x28] sm:$0xff] }
  0x3f   : > { %1913 = vst [vmem:[#allocation42_spill] sm:$0xff] %v1225_v62  ;;  %v392_v15 = vmul.f32 %v1225_v62, %v1135_v35  ;;  %v397_v17 = vmul.f32 %v1157_v41, %v1051_v10  ;;  %v401_v30 = vmul.f32 %v1197_v50, %v1057_v12  ;;  %v884_v62 = vld [vmem:[%s1194_s9 + $0x30] sm:$0xff]  ;;  %v1936_v56 = vld [vmem:[#allocation14_spill] sm:$0xff]  ;;  %v1367_v9 = vadd.f32 %v371_v28, %v366_v46 }
  0x40   : > { %1914 = vst [vmem:[#allocation43_spill] sm:$0xff] %v1228_v63  ;;  %v1309_v44 = vadd.f32 %v370_v19, %v361_v23  ;;  %v390_v23 = vmul.f32 %v1098_v25, %v1135_v35  ;;  %v402_v35 = vmul.f32 %v1197_v50, %v1060_v14  ;;  %v407_v55 = vmul.f32 %v1214_v57, %v1936_v56 }
  0x41   : > { %1915 = vst [vmem:[#allocation44_spill] sm:$0xff] %v1231_v1  ;;  %v415_v3 = vadd.f32 %v403_v13, %v391_v16  ;;  %v423_v56 = vmul.f32 %v884_v62, %v1034_v0  ;;  %v437_v62 = vmul.f32 %v1293_v48, %v1051_v10 }
  0x42   : > { %1916 = vst [vmem:[#allocation45_spill] sm:$0xff] %v1243_v7  ;;  %v365_v7 = vsub.f32 %v341_v60, %v353_v43  ;;  %v1307_v43 = vadd.f32 %v369_v26, %v360_v29  ;;  %v393_v26 = vmul.f32 %v1228_v63, %v1138_v36  ;;  %v394_v29 = vmul.f32 %v1231_v1, %v1138_v36 }
  0x43   : > { %1917 = vst [vmem:[#allocation46_spill] sm:$0xff] %v1246_v8  ;;  %v399_v60 = vmul.f32 %v1157_v41, %v1930_v59  ;;  %v414_v8 = vadd.f32 %v402_v35, %v390_v23 }
  0x44   : > { %1918 = vst [vmem:[#allocation47_spill] sm:$0xff] %v1291_v52  ;;  %v1317_v49 = vadd.f32 %v370_v19, %v365_v7  ;;  %v398_v19 = vmul.f32 %v1157_v41, %v1054_v11  ;;  %v400_v7 = vmul.f32 %v1157_v41, %v1933_v6  ;;  %v1935_v52 = vld [vmem:[#allocation23_spill] sm:$0xff]  ;;  %v421_v41 = vmul.f32 %v882_v42, %v1034_v0 }
  0x45   : > { %1919 = vst [vmem:[#allocation48_spill] sm:$0xff] %v1293_v48  ;;  %v422_v6 = vmul.f32 %v883_v53, %v1034_v0  ;;  %v411_v63 = vadd.f32 %v399_v60, %v387_v32  ;;  %v1956_v60 = vld [vmem:[#allocation18_spill] sm:$0xff] }
  0x46   : > { %1920 = vst [vmem:[#allocation49_spill] sm:$0xff] %v1301_v39  ;;  %v410_v1 = vadd.f32 %v398_v19, %v386_v34 }
  0x47   : > { %1921 = vst [vmem:[#allocation50_spill] sm:$0xff] %v1303_v37  ;;  %v1379_v46 = vadd.f32 %v422_v6, %v414_v8  ;;  %v439_v8 = vmul.f32 %v1303_v37, %v1930_v59  ;;  %v1953_v35 = vld [vmem:[#allocation43_spill] sm:$0xff] }
  0x48   : > { %1922 = vst [vmem:[#allocation51_spill] sm:$0xff] %v1305_v38  ;;  %v409_v38 = vadd.f32 %v397_v17, %v385_v33  ;;  %v1375_v17 = vadd.f32 %v422_v6, %v410_v1  ;;  %v1393_v1 = vadd.f32 %v423_v56, %v415_v3  ;;  %v1954_v53 = vld [vmem:[#allocation44_spill] sm:$0xff] }
  0x49   : > { %1923 = vst [vmem:[#allocation52_spill] sm:$0xff] %v1307_v43  ;;  %v1929_v54 = vld [vmem:[#allocation45_spill] sm:$0xff] }
  0x4a   : > { %1924 = vst [vmem:[#allocation53_spill] sm:$0xff] %v1309_v44  ;;  %v395_v58 = vmul.f32 %v1929_v54, %v1138_v36  ;;  %v885_v54 = vld [vmem:[%s1194_s9 + $0x38] sm:$0xff]  ;;  %v413_v36 = vadd.f32 %v401_v30, %v389_v40  ;;  %v1373_v23 = vadd.f32 %v421_v41, %v409_v38 }
  0x4b   : > { %1925 = vst [vmem:[#allocation54_spill] sm:$0xff] %v1311_v31  ;;  %v408_v31 = vmul.f32 %v1214_v57, %v1937_v22  ;;  %v1371_v57 = vadd.f32 %v372_v18, %v367_v51  ;;  %v438_v18 = vmul.f32 %v1301_v39, %v1054_v11 }
  0x4c   : > { %1926 = vst [vmem:[#allocation55_spill] sm:$0xff] %v1313_v45  ;;  %v404_v45 = vmul.f32 %v1197_v50, %v1935_v52  ;;  %v417_v50 = vadd.f32 %v405_v2, %v393_v26  ;;  %v418_v52 = vadd.f32 %v406_v4, %v394_v29  ;;  %v419_v34 = vadd.f32 %v407_v55, %v395_v58  ;;  %v1951_v26 = vld [vmem:[#allocation11_spill] sm:$0xff]  ;;  %v1958_v4 = vld [vmem:[#allocation13_spill] sm:$0xff] }
  0x4d   : > { %1927 = vst [vmem:[#allocation56_spill] sm:$0xff] %v1315_v47  ;;  %v424_v47 = vmul.f32 %v885_v54, %v1034_v0  ;;  %v420_v40 = vadd.f32 %v408_v31, %v396_v5  ;;  %v1377_v28 = vadd.f32 %v421_v41, %v413_v36  ;;  %v1389_v55 = vadd.f32 %v423_v56, %v411_v63  ;;  %v1961_v36 = vld [vmem:[#allocation17_spill] sm:$0xff] }
  0x4e   : > { %1928 = vst [vmem:[#allocation57_spill] sm:$0xff] %v1317_v49  ;;  %v412_v49 = vadd.f32 %v400_v7, %v388_v27  ;;  %v416_v33 = vadd.f32 %v404_v45, %v392_v15  ;;  %v1381_v32 = vadd.f32 %v421_v41, %v417_v50  ;;  %v1383_v27 = vadd.f32 %v422_v6, %v418_v52  ;;  %v1960_v7 = vld [vmem:[#allocation14_spill] sm:$0xff]  ;;  %v1962_v50 = vld [vmem:[#allocation40_spill] sm:$0xff] }
  0x4f   : > { %1938 = vst [vmem:[#allocation58_spill] sm:$0xff] %v1367_v9  ;;  %v1399_v31 = vadd.f32 %v423_v56, %v419_v34  ;;  %v441_v52 = vmul.f32 %v1307_v43, %v1057_v12  ;;  %v442_v45 = vmul.f32 %v1309_v44, %v1060_v14  ;;  %v449_v63 = vmul.f32 %v1083_v20, %v1373_v23  ;;  %v1957_v2 = vld [vmem:[#allocation51_spill] sm:$0xff]  ;;  %v1963_v34 = vld [vmem:[#allocation41_spill] sm:$0xff] }
  0x50   : > { %1939 = vst [vmem:[#allocation59_spill] sm:$0xff] %v1373_v23  ;;  %v1391_v51 = vadd.f32 %v424_v47, %v412_v49  ;;  %v1397_v38 = vadd.f32 %v424_v47, %v416_v33  ;;  %v450_v49 = vmul.f32 %v1086_v21, %v1375_v17  ;;  %v453_v16 = vmul.f32 %v1095_v24, %v1377_v28  ;;  %v1965_v24 = vld [vmem:[#allocation42_spill] sm:$0xff] }
  0x51   : > { %1940 = vst [vmem:[#allocation60_spill] sm:$0xff] %v1375_v17  ;;  %v454_v15 = vmul.f32 %v1098_v25, %v1379_v46  ;;  %v457_v42 = vmul.f32 %v1953_v35, %v1381_v32  ;;  %v458_v54 = vmul.f32 %v1954_v53, %v1383_v27  ;;  %v1421_v58 = vadd.f32 %v424_v47, %v420_v40  ;;  %v1964_v47 = vld [vmem:[#allocation45_spill] sm:$0xff]  ;;  %v1966_v53 = vld [vmem:[#allocation23_spill] sm:$0xff] }
  0x52   : > { %1941 = vst [vmem:[#allocation61_spill] sm:$0xff] %v1377_v28  ;;  %v440_v3 = vmul.f32 %v1957_v2, %v1956_v60  ;;  %v1959_v5 = vld [vmem:[#allocation54_spill] sm:$0xff]  ;;  %v447_v13 = vmul.f32 %v1367_v9, %v1960_v7  ;;  %v451_v41 = vmul.f32 %v1961_v36, %v1389_v55  ;;  %v452_v33 = vmul.f32 %v1962_v50, %v1391_v51 }
  0x53   : > { %1942 = vst [vmem:[#allocation62_spill] sm:$0xff] %v1379_v46  ;;  %v443_v6 = vmul.f32 %v1959_v5, %v1958_v4  ;;  %v455_v0 = vmul.f32 %v1963_v34, %v1393_v1  ;;  %v459_v40 = vmul.f32 %v1964_v47, %v1399_v31  ;;  %v462_v2 = vadd.f32 %v450_v49, %v438_v18  ;;  %v1967_v50 = vld [vmem:[#allocation55_spill] sm:$0xff] }
  0x54   : > { %1943 = vst [vmem:[#allocation63_spill] sm:$0xff] %v1381_v32  ;;  %v1950_v56 = vld [vmem:[#allocation56_spill] sm:$0xff]  ;;  %v466_v25 = vadd.f32 %v454_v15, %v442_v45  ;;  %v545_v9 = vmul.f32 %v1963_v34, %v1963_v34  ;;  %v546_v43 = vmul.f32 %v1965_v24, %v1965_v24  ;;  %v1443_v36 = vmul.f32 %v1967_v50, %v1966_v53 }
  0x55   : > { %1944 = vst [vmem:[#allocation64_spill] sm:$0xff] %v1383_v27  ;;  %v445_v19 = vmul.f32 %v1950_v56, %v1931_v61  ;;  %v1952_v29 = vld [vmem:[#allocation57_spill] sm:$0xff]  ;;  %v465_v56 = vadd.f32 %v453_v16, %v441_v52  ;;  %v1447_v37 = vmul.f32 %v1371_v57, %v1937_v22  ;;  %v547_v18 = vmul.f32 %v1953_v35, %v1953_v35  ;;  %v1968_v52 = vld [vmem:[#allocation46_spill] sm:$0xff] }
  0x56   : > { %1945 = vst [vmem:[#allocation65_spill] sm:$0xff] %v1389_v55  ;;  %v446_v30 = vmul.f32 %v1952_v29, %v1951_v26  ;;  %v461_v29 = vadd.f32 %v449_v63, %v437_v62  ;;  %v1451_v62 = vmul.f32 %v1965_v24, %v1397_v38  ;;  %v1457_v45 = vmul.f32 %v1968_v52, %v1421_v58 }
  0x57   : > { %1946 = vst [vmem:[#allocation66_spill] sm:$0xff] %v1391_v51  ;;  %v469_v5 = vadd.f32 %v457_v42, %v445_v19  ;;  %v1459_v63 = vadd.f32 %v451_v41, %v439_v8  ;;  %v1461_v49 = vadd.f32 %v452_v33, %v440_v3  ;;  %v1463_v16 = vadd.f32 %v455_v0, %v443_v6 }
  0x58   : > { %1947 = vst [vmem:[#allocation67_spill] sm:$0xff] %v1393_v1  ;;  %v470_v44 = vadd.f32 %v458_v54, %v446_v30  ;;  %v1465_v15 = vadd.f32 %v459_v40, %v447_v13  ;;  %v1467_v19 = vadd.f32 %v462_v2, %v461_v29  ;;  %v1469_v30 = vadd.f32 %v466_v25, %v465_v56  ;;  %v1972_v40 = vld [vmem:[#allocation50_spill] sm:$0xff] }
  0x59   : > { %1948 = vst [vmem:[#allocation68_spill] sm:$0xff] %v1397_v38  ;;  %v1473_v42 = vmul.f32 %v1373_v23, %v1051_v10  ;;  %v483_v8 = vmul.f32 %v1375_v17, %v1054_v11  ;;  %v1481_v3 = vmul.f32 %v1389_v55, %v1930_v59  ;;  %v1485_v0 = vmul.f32 %v1391_v51, %v1956_v60  ;;  %v1977_v60 = vld [vmem:[#allocation21_spill] sm:$0xff]  ;;  %v1978_v59 = vld [vmem:[#allocation32_spill] sm:$0xff] }
  0x5a   : > { %1949 = vst [vmem:[#allocation69_spill] sm:$0xff] %v1399_v31  ;;  %v1475_v54 = vadd.f32 %v470_v44, %v469_v5  ;;  %v486_v25 = vmul.f32 %v1377_v28, %v1057_v12  ;;  %v487_v56 = vmul.f32 %v1379_v46, %v1060_v14  ;;  %v1493_v44 = vmul.f32 %v1393_v1, %v1958_v4  ;;  %v1974_v4 = vld [vmem:[#allocation44_spill] sm:$0xff]  ;;  %v1980_v10 = vld [vmem:[#allocation33_spill] sm:$0xff] }
  0x5b   : > { %1955 = vst [vmem:[#allocation70_spill] sm:$0xff] %v1421_v58  ;;  %v1497_v29 = vmul.f32 %v1397_v38, %v1966_v53  ;;  %v490_v2 = vmul.f32 %v1381_v32, %v1931_v61  ;;  %v491_v5 = vmul.f32 %v1383_v27, %v1951_v26  ;;  %v1505_v6 = vmul.f32 %v1399_v31, %v1960_v7  ;;  %v1973_v53 = vld [vmem:[#allocation17_spill] sm:$0xff]  ;;  %v1975_v14 = vld [vmem:[#allocation52_spill] sm:$0xff]  ;;  %v1976_v7 = vld [vmem:[#allocation19_spill] sm:$0xff] }
  0x5c   : > { %1969 = vst [vmem:[#allocation55_spill] sm:$0xff] %v1461_v49  ;;  %v1509_v13 = vmul.f32 %v1421_v58, %v1937_v22  ;;  %v494_v41 = vmul.f32 %v1083_v20, %v1293_v48  ;;  %v495_v33 = vmul.f32 %v1086_v21, %v1301_v39  ;;  %v1517_v61 = vmul.f32 %v1973_v53, %v1972_v40  ;;  %v1979_v20 = vld [vmem:[#allocation22_spill] sm:$0xff]  ;;  %v1981_v21 = vld [vmem:[#allocation53_spill] sm:$0xff]  ;;  %v1982_v31 = vld [vmem:[#allocation20_spill] sm:$0xff] }
  0x5d   : > { %1970 = vst [vmem:[#allocation71_spill] sm:$0xff] %v1497_v29  ;;  %v548_v26 = vmul.f32 %v1974_v4, %v1974_v4  ;;  %v498_v12 = vmul.f32 %v1976_v7, %v1975_v14  ;;  %v549_v22 = vmul.f32 %v1964_v47, %v1964_v47  ;;  %v551_v11 = vadd.f32 %v1978_v59, %v1977_v60  ;;  %v1983_v53 = vld [vmem:[#allocation54_spill] sm:$0xff]  ;;  %v1984_v1 = vld [vmem:[#allocation25_spill] sm:$0xff]  ;;  %v1985_v7 = vld [vmem:[#allocation35_spill] sm:$0xff]  ;;  %s912_s11 = spop %911 }
  0x5e   : > { %1971 = vst [vmem:[#allocation72_spill] sm:$0xff] %v1509_v13  ;;  %v552_v58 = vadd.f32 %v1980_v10, %v1979_v20  ;;  %v499_v27 = vmul.f32 %v1982_v31, %v1981_v21  ;;  %v500_v32 = vmul.f32 %v1963_v34, %v1983_v53  ;;  %v550_v38 = vmul.f32 %v1968_v52, %v1968_v52  ;;  %v1986_v28 = vld [vmem:[#allocation56_spill] sm:$0xff]  ;;  %v1987_v55 = vld [vmem:[#allocation29_spill] sm:$0xff]  ;;  %v1988_v59 = vld [vmem:[#allocation34_spill] sm:$0xff] }
  0x5f   : > { %v555_v46 = vadd.f32 %v1985_v7, %v1984_v1  ;;  %v502_v51 = vmul.f32 %v1953_v35, %v1986_v28  ;;  %v553_v60 = vadd.f32 %v1988_v59, %v1987_v55  ;;  %v1989_v10 = vld [vmem:[#allocation26_spill] sm:$0xff]  ;;  %v1990_v20 = vld [vmem:[#allocation36_spill] sm:$0xff]  ;;  %v1992_v21 = vld [vmem:[#allocation57_spill] sm:$0xff] }
  0x60   : > { %v556_v17 = vadd.f32 %v1990_v20, %v1989_v10  ;;  %v1991_v31 = vld [vmem:[#allocation30_spill] sm:$0xff]  ;;  %v503_v34 = vmul.f32 %v1974_v4, %v1992_v21  ;;  %v1993_v53 = vld [vmem:[#allocation37_spill] sm:$0xff]  ;;  %v1994_v14 = vld [vmem:[#allocation47_spill] sm:$0xff]  ;;  %v563_v55 = vadd.f32 %v552_v58, %v551_v11  ;;  %v501_v58 = vmul.f32 %v1965_v24, %v1967_v50 }
  0x61   : > { %v557_v23 = vadd.f32 %v545_v9, %v1991_v31  ;;  %v554_v40 = vadd.f32 %v1994_v14, %v1993_v53  ;;  %v1995_v39 = vld [vmem:[#allocation27_spill] sm:$0xff]  ;;  %v1996_v7 = vld [vmem:[#allocation28_spill] sm:$0xff]  ;;  %v1997_v35 = vld [vmem:[#allocation38_spill] sm:$0xff]  ;;  %v506_v9 = vsub.f32 %v1473_v42, %v494_v41  ;;  %v507_v14 = vsub.f32 %v483_v8, %v495_v33 }
  0x62   : > { %v559_v1 = vadd.f32 %v547_v18, %v1995_v39  ;;  %v560_v48 = vadd.f32 %v548_v26, %v1996_v7  ;;  %v558_v28 = vadd.f32 %v546_v43, %v1997_v35  ;;  %v1998_v49 = vld [vmem:[#allocation31_spill] sm:$0xff]  ;;  %v566_v59 = vadd.f32 %v556_v17, %v555_v46  ;;  %v1999_v29 = vld [vmem:[#allocation58_spill] sm:$0xff]  ;;  %v2002_v17 = vld [vmem:[#allocation40_spill] sm:$0xff] }
  0x63   : > { %v561_v13 = vadd.f32 %v549_v22, %v1998_v49  ;;  %v504_v10 = vmul.f32 %v1964_v47, %v1999_v29  ;;  %v2000_v31 = vld [vmem:[#allocation39_spill] sm:$0xff]  ;;  %v510_v39 = vsub.f32 %v486_v25, %v498_v12  ;;  %v564_v53 = vadd.f32 %v563_v55, %v553_v60 }
  0x64   : > { %v562_v20 = vadd.f32 %v550_v38, %v2000_v31  ;;  %v569_v4 = vadd.f32 %v560_v48, %v559_v1  ;;  %v567_v26 = vadd.f32 %v566_v59, %v557_v23  ;;  %v511_v18 = vsub.f32 %v487_v56, %v499_v27  ;;  %v2001_v11 = vld [vmem:[#allocation51_spill] sm:$0xff]  ;;  %v2007_v59 = vld [vmem:[#allocation48_spill] sm:$0xff] }
  0x65   : > { %v514_v43 = vsub.f32 %v490_v2, %v502_v51  ;;  %v515_v35 = vsub.f32 %v491_v5, %v503_v34  ;;  %v497_v46 = vmul.f32 %v2002_v17, %v2001_v11  ;;  %v565_v49 = vadd.f32 %v564_v53, %v554_v40  ;;  %v2004_v40 = vld [vmem:[#allocation71_spill] sm:$0xff]  ;;  %v2010_v53 = vld [vmem:[#allocation52_spill] sm:$0xff] }
  0x66   : > { %v570_v22 = vadd.f32 %v569_v4, %v561_v13  ;;  %v568_v42 = vadd.f32 %v567_v26, %v558_v28  ;;  %v505_v48 = vmul.f32 %v1968_v52, %v1371_v57  ;;  %v508_v12 = vsub.f32 %v1481_v3, %v1517_v61  ;;  %v2003_v4 = vld [vmem:[#allocation5_spill] sm:$0xff] }
  0x67   : > { %v576_v23 = vstv %s575_s10  ;;  %v512_v27 = vsub.f32 %v1493_v44, %v500_v32  ;;  %v516_v51 = vsub.f32 %v1505_v6, %v504_v10  ;;  %v572_v34 = vmul.f32 %v565_v49, %v2003_v4 }
  0x68   : > { %v571_v38 = vadd.f32 %v570_v22, %v562_v20  ;;  %v573_v8 = vmul.f32 %v568_v42, %v2003_v4  ;;  %v518_v25 = vadd.f32 %v507_v14, %v506_v9  ;;  %v521_v56 = vadd.f32 %v511_v18, %v510_v39  ;;  %v2008_v9 = vld [vmem:[#allocation49_spill] sm:$0xff]  ;;  %v2009_v20 = vld [vmem:[#allocation50_spill] sm:$0xff] }
  0x69   : > { %v524_v2 = vadd.f32 %v515_v35, %v514_v43  ;;  %v468_v5 = vadd.f32 %v1451_v62, %v1443_v36  ;;  %v472_v61 = vadd.f32 %v1457_v45, %v1447_v37  ;;  %v577_v3 = vadd.f32 %v576_v23, %v572_v34  ;;  %v2005_v62 = vld [vmem:[#allocation72_spill] sm:$0xff]  ;;  %v2011_v35 = vld [vmem:[#allocation53_spill] sm:$0xff]  ;;  %v2014_v34 = vld [vmem:[#allocation59_spill] sm:$0xff] }
  0x6a   : > { %v574_v28 = vmul.f32 %v571_v38, %v2003_v4  ;;  %v578_v13 = vadd.f32 %v576_v23, %v573_v8  ;;  %v474_v32 = vadd.f32 %v1467_v19, %v1459_v63  ;;  %v477_v44 = vadd.f32 %v1469_v30, %v1463_v16  ;;  %v2006_v19 = vld [vmem:[#allocation55_spill] sm:$0xff] }
  0x6b   : > { %v480_v6 = vadd.f32 %v1475_v54, %v1465_v15  ;;  %v509_v33 = vsub.f32 %v1485_v0, %v497_v46  ;;  %v513_v36 = vsub.f32 %v2004_v40, %v501_v58  ;;  %v517_v60 = vsub.f32 %v2005_v62, %v505_v48  ;;  %v2012_v46 = vld [vmem:[#allocation54_spill] sm:$0xff] }
  0x6c   : > { %v579_v41 = vadd.f32 %v576_v23, %v574_v28  ;;  %940 = vrcp.f32 %v577_v3  ;;  %v519_v37 = vadd.f32 %v518_v25, %v508_v12  ;;  %v522_v45 = vadd.f32 %v521_v56, %v512_v27  ;;  %v2013_v12 = vld [vmem:[#allocation56_spill] sm:$0xff] }
  0x6d   : > { %v525_v1 = vadd.f32 %v524_v2, %v516_v51  ;;  %942 = vrcp.f32 %v578_v13  ;;  %v598_v63 = vstv %s912_s11  ;;  %v475_v7 = vadd.f32 %v474_v32, %v2006_v19  ;;  %v2016_v25 = vld [vmem:[#allocation60_spill] sm:$0xff]  ;;  %v2018_v2 = vld [vmem:[#allocation65_spill] sm:$0xff] }
  0x6e   : > { %944 = vrcp.f32 %v579_v41  ;;  %v478_v16 = vadd.f32 %v477_v44, %v468_v5  ;;  %v481_v30 = vadd.f32 %v480_v6, %v472_v61  ;;  %v520_v55 = vadd.f32 %v519_v37, %v509_v33  ;;  %v2026_v6 = vld [vmem:[#allocation67_spill] sm:$0xff]  ;;  %v2028_v33 = vld [vmem:[#allocation68_spill] sm:$0xff]  ;;  %v2035_v19 = vld [vmem:[#allocation69_spill] sm:$0xff] }
  0x6f   : > { %v523_v15 = vadd.f32 %v522_v45, %v513_v36  ;;  %v526_v54 = vadd.f32 %v525_v1, %v517_v60  ;;  %v1586_v0 = vmul.f32 %v598_v63, %v2007_v59  ;;  %v1589_v31 = vmul.f32 %v598_v63, %v2008_v9  ;;  %v2030_v36 = vld [vmem:[#allocation63_spill] sm:$0xff]  ;;  %v2033_v45 = vld [vmem:[#allocation64_spill] sm:$0xff] }
  0x70   : > { %v1592_v14 = vmul.f32 %v598_v63, %v2009_v20  ;;  %v1595_v39 = vmul.f32 %v598_v63, %v2001_v11  ;;  %v1598_v26 = vmul.f32 %v598_v63, %v2010_v53  ;;  %v1601_v22 = vmul.f32 %v598_v63, %v2011_v35  ;;  %v2038_v53 = vld [vmem:[#allocation70_spill] sm:$0xff] }
  0x71   : > { %v1604_v58 = vmul.f32 %v598_v63, %v2012_v46  ;;  %v1607_v49 = vmul.f32 %v598_v63, %v1967_v50  ;;  %v1610_v38 = vmul.f32 %v598_v63, %v2013_v12  ;;  %v1613_v11 = vmul.f32 %v598_v63, %v1992_v21  ;;  %v2020_v21 = vld [vmem:[#allocation66_spill] sm:$0xff]  ;;  %v2043_v12 = vld [vmem:[#allocation12_spill] sm:$0xff] }
  0x72   : > { %v941_v10 = vpop.eup %940  ;;  %v1616_v23 = vmul.f32 %v598_v63, %v1999_v29  ;;  %v1619_v4 = vmul.f32 %v598_v63, %v1371_v57  ;;  %v1622_v8 = vmul.f32 %v598_v63, %v2014_v34  ;;  %v1625_v56 = vmul.f32 %v598_v63, %v2016_v25  ;;  %v2024_v57 = vld [vmem:[#allocation62_spill] sm:$0xff]  ;;  %v2047_v34 = vld [vmem:[#allocation13_spill] sm:$0xff] }
  0x73   : > { %v943_v18 = vpop.eup %942  ;;  %v583_v43 = vmul.f32 %v941_v10, %v577_v3  ;;  %v1628_v28 = vmul.f32 %v598_v63, %v2018_v2  ;;  %v1631_v5 = vmul.f32 %v598_v63, %v2020_v21  ;;  %v2022_v3 = vld [vmem:[#allocation61_spill] sm:$0xff]  ;;  %v1637_v32 = vmul.f32 %v598_v63, %v2024_v57  ;;  %v2041_v46 = vld [vmem:[#allocation6_spill] sm:$0xff] }
  0x74   : > { %v945_v42 = vpop.eup %944  ;;  %v584_v48 = vmul.f32 %v943_v18, %v578_v13  ;;  %2015 = vst [vmem:[#allocation21_spill] sm:$0xff] %v1622_v8  ;;  %v1634_v13 = vmul.f32 %v598_v63, %v2022_v3  ;;  %v1643_v40 = vmul.f32 %v598_v63, %v2028_v33  ;;  %v1646_v62 = vmul.f32 %v598_v63, %v2030_v36  ;;  %v2049_v2 = vld [vmem:[#allocation10_spill] sm:$0xff]  ;;  %v2053_v33 = vld [vmem:[#allocation15_spill] sm:$0xff] }
  0x75   : > { %v585_v27 = vmul.f32 %v945_v42, %v579_v41  ;;  %v586_v51 = vsub.f32 2.0, %v583_v43  ;;  %2017 = vst [vmem:[#allocation32_spill] sm:$0xff] %v1625_v56  ;;  %v1640_v41 = vmul.f32 %v598_v63, %v2026_v6  ;;  %v1651_v1 = vmul.f32 %v598_v63, %v2033_v45  ;;  %v2051_v3 = vld [vmem:[#allocation14_spill] sm:$0xff]  ;;  %v2060_v56 = vld [vmem:[#allocation44_spill] sm:$0xff] }
  0x76   : > { %v587_v50 = vsub.f32 2.0, %v584_v48  ;;  %2019 = vst [vmem:[#allocation22_spill] sm:$0xff] %v1628_v28  ;;  %v1654_v59 = vmul.f32 %v598_v63, %v2035_v19  ;;  %v2055_v19 = vld [vmem:[#allocation17_spill] sm:$0xff] }
  0x77   : > { %2021 = vst [vmem:[#allocation33_spill] sm:$0xff] %v1631_v5  ;;  %v588_v29 = vsub.f32 2.0, %v585_v27  ;;  %v589_v61 = vmul.f32 %v941_v10, %v586_v51  ;;  %v2044_v51 = vld [vmem:[#allocation18_spill] sm:$0xff]  ;;  %v2059_v5 = vld [vmem:[#allocation43_spill] sm:$0xff] }
  0x78   : > { %2023 = vst [vmem:[#allocation25_spill] sm:$0xff] %v1634_v13  ;;  %v590_v44 = vmul.f32 %v943_v18, %v587_v50  ;;  %v1659_v18 = vmul.f32 %v598_v63, %v2038_v53  ;;  %v2046_v63 = vld [vmem:[#allocation9_spill] sm:$0xff]  ;;  %v2048_v50 = vld [vmem:[#allocation23_spill] sm:$0xff] }
  0x79   : > { %2025 = vst [vmem:[#allocation35_spill] sm:$0xff] %v1637_v32  ;;  %v591_v60 = vmul.f32 %v945_v42, %v588_v29  ;;  %v1648_v37 = vmul.f32 %v589_v61, %v475_v7  ;;  %v595_v9 = vmul.f32 %v589_v61, %v520_v55  ;;  %v2042_v42 = vld [vmem:[#allocation7_spill] sm:$0xff]  ;;  %v2045_v55 = vld [vmem:[#allocation8_spill] sm:$0xff] }
  0x7a   : > { %2027 = vst [vmem:[#allocation29_spill] sm:$0xff] %v1640_v41  ;;  %v1656_v10 = vmul.f32 %v590_v44, %v478_v16  ;;  %v596_v20 = vmul.f32 %v590_v44, %v523_v15  ;;  %v2050_v29 = vld [vmem:[#allocation11_spill] sm:$0xff]  ;;  %v2052_v44 = vld [vmem:[#allocation24_spill] sm:$0xff]  ;;  %v2058_v41 = vld [vmem:[#allocation41_spill] sm:$0xff] }
  0x7b   : > { %2029 = vst [vmem:[#allocation34_spill] sm:$0xff] %v1643_v40  ;;  %v1661_v43 = vmul.f32 %v591_v60, %v481_v30  ;;  %v597_v35 = vmul.f32 %v591_v60, %v526_v54  ;;  %v611_v7 = vmul.f32 %v1648_v37, %v2041_v46  ;;  %v612_v48 = vmul.f32 %v1648_v37, %v2042_v42  ;;  %v2054_v60 = vld [vmem:[#allocation16_spill] sm:$0xff] }
  0x7c   : > { %2031 = vst [vmem:[#allocation26_spill] sm:$0xff] %v1646_v62  ;;  %v613_v27 = vmul.f32 %v1648_v37, %v2043_v12  ;;  %v614_v16 = vmul.f32 %v1648_v37, %v2044_v51  ;;  %v615_v15 = vmul.f32 %v1656_v10, %v2045_v55  ;;  %v616_v30 = vmul.f32 %v1656_v10, %v2046_v63  ;;  %v2057_v62 = vld [vmem:[#allocation20_spill] sm:$0xff] }
  0x7d   : > { %2032 = vst [vmem:[#allocation36_spill] sm:$0xff] %v1648_v37  ;;  %v617_v54 = vmul.f32 %v1656_v10, %v2047_v34  ;;  %v618_v25 = vmul.f32 %v1656_v10, %v2048_v50  ;;  %v619_v21 = vmul.f32 %v1661_v43, %v2049_v2  ;;  %v620_v61 = vmul.f32 %v1661_v43, %v2050_v29 }
  0x7e   : > { %2034 = vst [vmem:[#allocation30_spill] sm:$0xff] %v1651_v1  ;;  %v621_v57 = vmul.f32 %v1661_v43, %v2051_v3  ;;  %v622_v6 = vmul.f32 %v1661_v43, %v2052_v44  ;;  %v623_v36 = vmul.f32 %v2053_v33, %v595_v9  ;;  %v624_v45 = vmul.f32 %v2054_v60, %v595_v9 }
  0x7f   : > { %2036 = vst [vmem:[#allocation57_spill] sm:$0xff] %v1654_v59  ;;  %v625_v53 = vmul.f32 %v2055_v19, %v595_v9  ;;  %v2056_v59 = vld [vmem:[#allocation19_spill] sm:$0xff]  ;;  %v628_v40 = vmul.f32 %v2057_v62, %v596_v20  ;;  %v629_v32 = vmul.f32 %v2058_v41, %v596_v20  ;;  %v630_v13 = vmul.f32 %v1965_v24, %v596_v20 }
  0x80   : > { %2037 = vst [vmem:[#allocation37_spill] sm:$0xff] %v1656_v10  ;;  %v627_v1 = vmul.f32 %v2056_v59, %v596_v20  ;;  %v631_v28 = vmul.f32 %v2059_v5, %v597_v35  ;;  %v632_v8 = vmul.f32 %v2060_v56, %v597_v35  ;;  %v634_v10 = vmul.f32 %v1968_v52, %v597_v35 }
  0x81   : > { %2039 = vst [vmem:[#allocation47_spill] sm:$0xff] %v1659_v18  ;;  %v626_v18 = vmul.f32 %v2002_v17, %v595_v9  ;;  %v635_v60 = vsub.f32 %v611_v7, %v623_v36  ;;  %v636_v19 = vsub.f32 %v612_v48, %v624_v45  ;;  %v637_v33 = vsub.f32 %v613_v27, %v625_v53 }
  0x82   : > { %2040 = vst [vmem:[#allocation27_spill] sm:$0xff] %v1661_v43  ;;  %v633_v43 = vmul.f32 %v1964_v47, %v597_v35  ;;  %v639_v37 = vsub.f32 %v615_v15, %v627_v1  ;;  %v640_v59 = vsub.f32 %v616_v30, %v628_v40  ;;  %v641_v44 = vsub.f32 %v617_v54, %v629_v32  ;;  %v2065_v1 = vld [vmem:[#allocation15_spill] sm:$0xff]  ;;  %v2073_v15 = vld [vmem:[#allocation42_spill] sm:$0xff] }
  0x83   : > { %v638_v17 = vsub.f32 %v614_v16, %v626_v18  ;;  %v642_v62 = vsub.f32 %v618_v25, %v630_v13  ;;  %v643_v3 = vsub.f32 %v619_v21, %v631_v28  ;;  %v644_v41 = vsub.f32 %v620_v61, %v632_v8 }
  0x84   : > { %v645_v29 = vsub.f32 %v621_v57, %v633_v43  ;;  %v646_v24 = vsub.f32 %v622_v6, %v634_v10  ;;  %v647_v5 = vsub.f32 %v1586_v0, %v635_v60  ;;  %v648_v56 = vsub.f32 %v1589_v31, %v636_v19  ;;  %v2066_v10 = vld [vmem:[#allocation16_spill] sm:$0xff]  ;;  %v2067_v43 = vld [vmem:[#allocation17_spill] sm:$0xff] }
  0x85   : > { %v649_v47 = vsub.f32 %v1592_v14, %v637_v33  ;;  %v650_v52 = vsub.f32 %v1595_v39, %v638_v17  ;;  %v651_v7 = vsub.f32 %v1598_v26, %v639_v37  ;;  %v652_v18 = vsub.f32 %v1601_v22, %v640_v59  ;;  %v2064_v37 = vld [vmem:[#allocation36_spill] sm:$0xff] }
  0x86   : > { %v653_v40 = vsub.f32 %v1604_v58, %v641_v44  ;;  %v654_v13 = vsub.f32 %v1607_v49, %v642_v62  ;;  %v655_v8 = vsub.f32 %v1610_v38, %v643_v3  ;;  %v656_v28 = vsub.f32 %v1613_v11, %v644_v41  ;;  %v2063_v41 = vld [vmem:[#allocation24_spill] sm:$0xff] }
  0x87   : > { %v657_v0 = vsub.f32 %v1616_v23, %v645_v29  ;;  %v658_v31 = vsub.f32 %v1619_v4, %v646_v24  ;;  %v671_v14 = vmul.f32 %v595_v9, %v2041_v46  ;;  %v672_v17 = vmul.f32 %v595_v9, %v2042_v42  ;;  %v2061_v23 = vld [vmem:[#allocation11_spill] sm:$0xff]  ;;  %v2062_v4 = vld [vmem:[#allocation14_spill] sm:$0xff]  ;;  %v2068_v42 = vld [vmem:[#allocation40_spill] sm:$0xff] }
  0x88   : > { %v673_v39 = vmul.f32 %v595_v9, %v2043_v12  ;;  %v674_v26 = vmul.f32 %v595_v9, %v2044_v51  ;;  %v675_v22 = vmul.f32 %v596_v20, %v2045_v55  ;;  %v676_v58 = vmul.f32 %v596_v20, %v2046_v63  ;;  %v2069_v48 = vld [vmem:[#allocation37_spill] sm:$0xff]  ;;  %v2070_v12 = vld [vmem:[#allocation19_spill] sm:$0xff]  ;;  %v2071_v51 = vld [vmem:[#allocation20_spill] sm:$0xff] }
  0x89   : > { %v677_v49 = vmul.f32 %v596_v20, %v2047_v34  ;;  %v678_v38 = vmul.f32 %v596_v20, %v2048_v50  ;;  %v679_v11 = vmul.f32 %v597_v35, %v2049_v2  ;;  %v680_v24 = vmul.f32 %v597_v35, %v2061_v23  ;;  %v2074_v30 = vld [vmem:[#allocation27_spill] sm:$0xff]  ;;  %v2076_v50 = vld [vmem:[#allocation44_spill] sm:$0xff]  ;;  %v2077_v2 = vld [vmem:[#allocation45_spill] sm:$0xff] }
  0x8a   : > { %v681_v32 = vmul.f32 %v597_v35, %v2062_v4  ;;  %v682_v62 = vmul.f32 %v597_v35, %v2063_v41  ;;  %v683_v59 = vmul.f32 %v2065_v1, %v2064_v37  ;;  %v684_v9 = vmul.f32 %v2066_v10, %v2064_v37  ;;  %v2072_v35 = vld [vmem:[#allocation41_spill] sm:$0xff]  ;;  %v2075_v34 = vld [vmem:[#allocation43_spill] sm:$0xff]  ;;  %v2078_v29 = vld [vmem:[#allocation46_spill] sm:$0xff] }
  0x8b   : > { %v685_v46 = vmul.f32 %v2067_v43, %v2064_v37  ;;  %v686_v20 = vmul.f32 %v2068_v42, %v2064_v37  ;;  %v687_v27 = vmul.f32 %v2070_v12, %v2069_v48  ;;  %v688_v16 = vmul.f32 %v2071_v51, %v2069_v48  ;;  %v2079_v41 = vld [vmem:[#allocation21_spill] sm:$0xff]  ;;  %v2080_v1 = vld [vmem:[#allocation32_spill] sm:$0xff]  ;;  %v2081_v43 = vld [vmem:[#allocation22_spill] sm:$0xff] }
  0x8c   : > { %v689_v55 = vmul.f32 %v2072_v35, %v2069_v48  ;;  %v690_v63 = vmul.f32 %v2073_v15, %v2069_v48  ;;  %v691_v54 = vmul.f32 %v2075_v34, %v2074_v30  ;;  %v692_v25 = vmul.f32 %v2076_v50, %v2074_v30  ;;  %v2082_v48 = vld [vmem:[#allocation33_spill] sm:$0xff] }
  0x8d   : > { %v693_v21 = vmul.f32 %v2077_v2, %v2074_v30  ;;  %v694_v61 = vmul.f32 %v2078_v29, %v2074_v30  ;;  %v695_v3 = vadd.f32 %v683_v59, %v671_v14  ;;  %v696_v57 = vadd.f32 %v684_v9, %v672_v17  ;;  %v2083_v14 = vld [vmem:[#allocation25_spill] sm:$0xff] }
  0x8e   : > { %v697_v44 = vadd.f32 %v685_v46, %v673_v39  ;;  %v698_v6 = vadd.f32 %v686_v20, %v674_v26  ;;  %v699_v33 = vadd.f32 %v687_v27, %v675_v22  ;;  %v700_v36 = vadd.f32 %v688_v16, %v676_v58  ;;  %v2084_v39 = vld [vmem:[#allocation35_spill] sm:$0xff]  ;;  %v2085_v22 = vld [vmem:[#allocation29_spill] sm:$0xff] }
  0x8f   : > { %v701_v60 = vadd.f32 %v689_v55, %v677_v49  ;;  %v702_v45 = vadd.f32 %v690_v63, %v678_v38  ;;  %v703_v19 = vadd.f32 %v691_v54, %v679_v11  ;;  %v704_v53 = vadd.f32 %v692_v25, %v680_v24  ;;  %v2086_v49 = vld [vmem:[#allocation34_spill] sm:$0xff]  ;;  %v2089_v59 = vld [vmem:[#allocation57_spill] sm:$0xff]  ;;  %v2090_v46 = vld [vmem:[#allocation47_spill] sm:$0xff] }
  0x90   : > { %v705_v23 = vadd.f32 %v693_v21, %v681_v32  ;;  %v706_v4 = vadd.f32 %v694_v61, %v682_v62  ;;  %v707_v37 = vsub.f32 %v2079_v41, %v695_v3  ;;  %v708_v10 = vsub.f32 %v2080_v1, %v696_v57  ;;  %v2087_v11 = vld [vmem:[#allocation26_spill] sm:$0xff] }
  0x91   : > { %v709_v42 = vsub.f32 %v2081_v43, %v697_v44  ;;  %v710_v12 = vsub.f32 %v2082_v48, %v698_v6  ;;  %v711_v17 = vsub.f32 %v2083_v14, %v699_v33  ;;  %v712_v26 = vsub.f32 %v2084_v39, %v700_v36  ;;  %v2088_v32 = vld [vmem:[#allocation30_spill] sm:$0xff] }
  0x92   : > { %v713_v58 = vsub.f32 %v2085_v22, %v701_v60  ;;  %v714_v38 = vsub.f32 %v2086_v49, %v702_v45  ;;  %v715_v24 = vsub.f32 %v2087_v11, %v703_v19  ;;  %v716_v62 = vsub.f32 %v2088_v32, %v704_v53 }
  0x93   : > { %v717_v9 = vsub.f32 %v2089_v59, %v705_v23  ;;  %v718_v20 = vsub.f32 %v2090_v46, %v706_v4  ;;  %v719_v27 = vadd.f32 %v651_v7, %v647_v5  ;;  %v721_v51 = vadd.f32 %v652_v18, %v648_v56 }
  0x94   : > { %v723_v16 = vadd.f32 %v653_v40, %v649_v47  ;;  %v725_v35 = vadd.f32 %v654_v13, %v650_v52  ;;  %v735_v55 = vadd.f32 %v711_v17, %v707_v37  ;;  %v737_v15 = vadd.f32 %v712_v26, %v708_v10 }
  0x95   : > { %v720_v63 = vadd.f32 %v719_v27, %v655_v8  ;;  %v722_v30 = vadd.f32 %v721_v51, %v656_v28  ;;  %v739_v34 = vadd.f32 %v713_v58, %v709_v42  ;;  %v741_v54 = vadd.f32 %v714_v38, %v710_v12 }
  0x96   : > { %v724_v50 = vadd.f32 %v723_v16, %v657_v0  ;;  %v726_v25 = vadd.f32 %v725_v35, %v658_v31  ;;  %v736_v2 = vadd.f32 %v735_v55, %v715_v24  ;;  %v738_v21 = vadd.f32 %v737_v15, %v716_v62 }
  0x97   : > { %v727_v29 = vmul.f32 0.33333334, %v720_v63  ;;  %v728_v5 = vmul.f32 0.33333334, %v722_v30  ;;  %v740_v56 = vadd.f32 %v739_v34, %v717_v9  ;;  %v742_v7 = vadd.f32 %v741_v54, %v718_v20 }
  0x98   : > { %v729_v47 = vmul.f32 0.33333334, %v724_v50  ;;  %v730_v52 = vmul.f32 0.33333334, %v726_v25  ;;  %v743_v18 = vmul.f32 0.33333334, %v736_v2 }
  0x99   : > { %731 = vst [vmem:[%s272_s14] sm:$0xff] %v727_v29  ;;  %v744_v40 = vmul.f32 0.33333334, %v738_v21  ;;  %v745_v13 = vmul.f32 0.33333334, %v740_v56  ;;  %v746_v8 = vmul.f32 0.33333334, %v742_v7 }
  0x9a   : > { %732 = vst [vmem:[%s272_s14 + $0x8] sm:$0xff] %v728_v5 }
  0x9b   : > { %733 = vst [vmem:[%s272_s14 + $0x10] sm:$0xff] %v729_v47 }
  0x9c   : > { %734 = vst [vmem:[%s272_s14 + $0x18] sm:$0xff] %v730_v52 }
  0x9d   : > { %901 = vst [vmem:[%s272_s14 + $0x20] sm:$0xff] %v743_v18 }
  0x9e   : > { %902 = vst [vmem:[%s272_s14 + $0x28] sm:$0xff] %v744_v40 }
  0x9f   : > { %903 = vst [vmem:[%s272_s14 + $0x30] sm:$0xff] %v745_v13 }
  0xa0   : > { %904 = vst [vmem:[%s272_s14 + $0x38] sm:$0xff] %v746_v8 }
  0xa1 PF: > { %s22_s21 = sadd.s32 1, %s982_s21   ;;  %s2091_s19 = smov %s978_s20 }
  0xa2   : > { %p19_p5 = scmp.ge.s32.totalorder %s22_s21, 4   ;;  %s2092_s20 = smov %s2094_s0 }
  0xa4   :  { %21 = sbr.rel (!%p19_p5) target bundleno = 8 (0x8), region = 72 }

</bundles_post_ra>
